<compile_context>
chip_gen: v7x
topology: tpu7x:2x2x1
jax: 0.10.0
libtpu: 0.0.40
codegen_flags: <defaults>
</compile_context>

<pallas_src>
import jax
import jax.numpy as jnp
from jax import lax
from jax.experimental import pallas as pl
from jax.experimental.pallas import tpu as pltpu


def _din_kernel(tid_ref, seq_ref, tet_ref, het_ref,
                wap_ref, bap_ref, w1a_ref, w1b_ref, b1_ref,
                w2_ref, b2_ref, w3_ref, b3_ref, out_ref):
    """One batch tile.  All activations are feature-major: (features, B_tile)."""
    L, Bt = seq_ref.shape
    D3, Vp = tet_ref.shape            # tables are (3*D, V_pad): bf16 hi/mid/lo planes
    D = D3 // 3
    scale = 1.0 / (D ** 0.5)

    tet = tet_ref[...]
    het = het_ref[...]

    def gather(ids_row, table):
        # ids_row: (1, Bt) int32 -> (D, Bt) f32 rows of the (logical f32) table.
        # TPU has no arbitrary-gather primitive, so the lookup is a one-hot matmul on
        # the otherwise-idle MXU.  The one-hot (exact in bf16) contracts against the
        # bf16 hi/mid/lo planes; summing the planes reconstructs f32 to ~1e-7.
        vocab = lax.broadcasted_iota(jnp.int32, (Vp, Bt), 0)
        onehot = (vocab == ids_row).astype(jnp.bfloat16)                    # (Vp, Bt)
        g = jnp.dot(table, onehot, preferred_element_type=jnp.float32)      # (3D, Bt)
        return g[:D, :] + g[D:2 * D, :] + g[2 * D:, :]                      # (D, Bt)

    # --- target branch (Plugin + target_trans are pre-folded into te_table) ---
    te = gather(tid_ref[...], tet)                                           # (D, Bt)

    # --- target attention over the click history, fused with the history gather as an
    #     online-softmax loop over sequence positions.  Per step the only sizable
    #     transient is the (Vp, Bt) one-hot; scores/probs/acc are tiny VPU/EUP work.
    def step(l, carry):
        m, ssum, acc = carry
        ids_l = seq_ref[pl.ds(l, 1), :]                                      # (1, Bt)
        h_l = gather(ids_l, het)                                             # (D, Bt)
        s_l = jnp.sum(h_l * te, axis=0, keepdims=True) * scale               # (1, Bt)
        s_l = jnp.where(ids_l != 0, s_l, jnp.float32(-1e9))                  # pad id == 0
        m_new = jnp.maximum(m, s_l)
        alpha = jnp.exp(m - m_new)
        p = jnp.exp(s_l - m_new)
        return m_new, alpha * ssum + p, alpha * acc + p * h_l

    m0 = jnp.full((1, Bt), -1e30, jnp.float32)
    _, ssum, acc = lax.fori_loop(
        0, L, step,
        (m0, jnp.zeros((1, Bt), jnp.float32), jnp.zeros((D, Bt), jnp.float32)))
    agg = acc / ssum                                                         # (D, Bt)

    # --- attention-output Plugin: tanh(W x + b), feature-major ---
    agg = jnp.tanh(jnp.dot(wap_ref[...], agg, preferred_element_type=jnp.float32)
                   + bap_ref[...])

    # --- classifier on concat([target, agg]) along features (split matmul, no concat) ---
    h = jnp.tanh(jnp.dot(w1a_ref[...], te, preferred_element_type=jnp.float32)
                 + jnp.dot(w1b_ref[...], agg, preferred_element_type=jnp.float32)
                 + b1_ref[...])
    h = jnp.tanh(jnp.dot(w2_ref[...], h, preferred_element_type=jnp.float32)
                 + b2_ref[...])
    out_ref[...] = (jnp.dot(w3_ref[...], h, preferred_element_type=jnp.float32)
                    + b3_ref[...])


def din_forward(target_id, clk_sequence, params):
    """Full DIN forward: int ids in, (B, 1) scores out, one fused Pallas kernel."""
    emb = params["emb_table"].astype(jnp.float32)
    V, D = emb.shape
    B = int(target_id.shape[0])
    L = int(clk_sequence.shape[1])

    # ---- Fold the per-row dense layers into the (vocab, D) tables (plain JAX, once).
    pe = jnp.tanh(emb @ params["wp"] + params["bp"])                 # shared id Plugin
    te_table = jnp.tanh(pe @ params["wt"] + params["bt"])            # target_trans
    he_table = jnp.tanh(pe @ params["ws"] + params["bs"])            # seq_trans

    V_pad = pl.cdiv(V, 128) * 128

    def hml_planes_t(table):
        # f32 (V, D) -> bf16 (3D, V_pad): hi/mid/lo planes, transposed (feature-major).
        t = jnp.pad(table, ((0, V_pad - V), (0, 0)))
        hi = t.astype(jnp.bfloat16)
        r1 = t - hi.astype(jnp.float32)
        mid = r1.astype(jnp.bfloat16)
        lo = (r1 - mid.astype(jnp.float32)).astype(jnp.bfloat16)
        return jnp.concatenate([hi.T, mid.T, lo.T], axis=0)          # (3D, V_pad)

    tet = hml_planes_t(te_table)
    het = hml_planes_t(he_table)

    # ---- Feature-major weights (batch stays on the 128-lane axis inside the kernel).
    wap_t = params["wap"].T
    bap_t = params["bap"].reshape(-1, 1)
    w1a_t = params["w1"][:D, :].T            # acts on the target half of the concat
    w1b_t = params["w1"][D:, :].T            # acts on the attention half
    b1_t = params["b1"].reshape(-1, 1)
    w2_t = params["w2"].T
    b2_t = params["b2"].reshape(-1, 1)
    w3_t = params["w3"].T
    b3_t = params["b3"].reshape(-1, 1)

    # ---- Batch tiling.
    #   * multiple of 128 -> unmasked lane-dense stores
    #   * capped so the (V_pad, B_tile) bf16 one-hot transient stays <= ~512 KiB
    #     (independent of L: the gather loops over sequence positions)
    #   * >= 2 tiles once B >= 256 so the "parallel" grid feeds both v7x TensorCores
    # NOTE: for much larger vocabularies (V_pad > ~2048) the gather should also be
    # chunked over V_pad; unnecessary at this model's V=500.
    if B <= 128:
        B_tile = B
    else:
        cap = max(128, ((512 * 1024) // (V_pad * 2)) // 128 * 128)
        half = pl.cdiv(pl.cdiv(B, 2), 128) * 128
        B_tile = max(128, min(512, cap, half))
    B_pad = pl.cdiv(B, B_tile) * B_tile
    num_tiles = B_pad // B_tile

    tid = target_id.astype(jnp.int32)
    seq = clk_sequence.astype(jnp.int32)
    if B_pad != B:
        tid = jnp.pad(tid, (0, B_pad - B))                 # pad id 0 -> fully masked row
        seq = jnp.pad(seq, ((0, B_pad - B), (0, 0)))
    tid_t = tid.reshape(1, B_pad)
    seq_t = seq.T                                          # (L, B_pad), single copy

    def pinned(x):  # whole array, constant block index -> DMA'd to VMEM once
        return pl.BlockSpec(x.shape, lambda i: (0, 0))

    # Per-tile VMEM transient estimate -> explicit scoped-VMEM limit.
    est = (6 * V_pad * B_tile * 2            # one-hot + compare temporaries
           + 2 * 3 * D * V_pad * 2           # pinned bf16 tables
           + 4 * B_tile * (L + 4) * 4        # double-buffered ids + output + carries
           + (2 << 20))
    vmem_limit = int(min(max(est, 32 << 20), 48 << 20))

    out = pl.pallas_call(
        _din_kernel,
        out_shape=jax.ShapeDtypeStruct((1, B_pad), jnp.float32),
        grid=(num_tiles,),
        in_specs=[
            pl.BlockSpec((1, B_tile), lambda i: (0, i)),   # target ids
            pl.BlockSpec((L, B_tile), lambda i: (0, i)),   # click sequence (transposed)
            pinned(tet), pinned(het),
            pinned(wap_t), pinned(bap_t),
            pinned(w1a_t), pinned(w1b_t), pinned(b1_t),
            pinned(w2_t), pinned(b2_t),
            pinned(w3_t), pinned(b3_t),
        ],
        out_specs=pl.BlockSpec((1, B_tile), lambda i: (0, i)),   # lane-dense output
        compiler_params=pltpu.CompilerParams(
            dimension_semantics=("parallel",),
            vmem_limit_bytes=vmem_limit),
    )(tid_t, seq_t, tet, het, wap_t, bap_t,
      w1a_t, w1b_t, b1_t, w2_t, b2_t, w3_t, b3_t)

    return out[0, :B].reshape(B, 1)


def make_params(key, vocab=500, D=8, classifier=(64, 32)):
    keys = jax.random.split(key, 16)
    H1, H2 = classifier

    def dense(kw, kb, fan_in, fan_out):
        w = jax.random.normal(kw, (fan_in, fan_out), jnp.float32) * (1.0 / jnp.sqrt(fan_in))
        b = jax.random.normal(kb, (1, fan_out), jnp.float32) * 0.01
        return w, b

    emb_table = jax.random.normal(keys[0], (vocab, D), jnp.float32) * 0.1
    wp, bp = dense(keys[1], keys[2], D, D)
    wt, bt = dense(keys[3], keys[4], D, D)
    ws, bs = dense(keys[5], keys[6], D, D)
    wap, bap = dense(keys[7], keys[8], D, D)
    w1, b1 = dense(keys[9], keys[10], 2 * D, H1)
    w2, b2 = dense(keys[11], keys[12], H1, H2)
    w3, b3 = dense(keys[13], keys[14], H2, 1)
    return dict(emb_table=emb_table, wp=wp, bp=bp, wt=wt, bt=bt, ws=ws, bs=bs,
                wap=wap, bap=bap, w1=w1, b1=b1, w2=w2, b2=b2, w3=w3, b3=b3)


def din_forward_ref(target_id, clk_sequence, p):
    """Pure-JAX reference for correctness checking."""
    D = p["emb_table"].shape[1]
    te = p["emb_table"][target_id]
    te = jnp.tanh(te @ p["wp"] + p["bp"])
    te = jnp.tanh(te @ p["wt"] + p["bt"])
    he = p["emb_table"][clk_sequence]
    he = jnp.tanh(he @ p["wp"] + p["bp"])
    he = jnp.tanh(he @ p["ws"] + p["bs"])
    mask = (clk_sequence != 0)
    scores = jnp.einsum("bd,bld->bl", te, he) / jnp.sqrt(jnp.float32(D))
    scores = jnp.where(mask, scores, -1e9)
    probs = jax.nn.softmax(scores, axis=-1)
    agg = jnp.einsum("bl,bld->bd", probs, he)
    agg = jnp.tanh(agg @ p["wap"] + p["bap"])
    x = jnp.concatenate([te, agg], axis=1)
    h = jnp.tanh(x @ p["w1"] + p["b1"])
    h = jnp.tanh(h @ p["w2"] + p["b2"])
    return h @ p["w3"] + p["b3"]


if __name__ == "__main__":
    VOCAB, D, L = 500, 8, 8
    key = jax.random.PRNGKey(0)
    k_par, k_tgt, k_seq = jax.random.split(key, 3)
    params = make_params(k_par, vocab=VOCAB, D=D)

    # Case 1: tiny batch (single tile; block == full array dims).
    B = 2
    target_id = jax.random.randint(k_tgt, (B,), 1, VOCAB, dtype=jnp.int32)
    clk_sequence = jax.random.randint(k_seq, (B, L), 0, VOCAB, dtype=jnp.int32)
    clk_sequence = clk_sequence.at[:, -2:].set(0)        # exercise the pad-id mask
    out = jax.block_until_ready(din_forward(target_id, clk_sequence, params))
    ref = din_forward_ref(target_id, clk_sequence, params)
    assert out.shape == (B, 1)
    # bf16 hi/mid/lo table reconstruction keeps the kernel ~f32-exact (observed err ~1e-6)
    assert jnp.allclose(out, ref, rtol=1e-4, atol=2e-5), (out, ref)

    # Case 2: multi-tile batch (exercises batch padding + the 2-tile "parallel" grid).
    B2 = 192
    k_tgt2, k_seq2 = jax.random.split(jax.random.PRNGKey(1))
    target_id2 = jax.random.randint(k_tgt2, (B2,), 1, VOCAB, dtype=jnp.int32)
    clk_sequence2 = jax.random.randint(k_seq2, (B2, L), 0, VOCAB, dtype=jnp.int32)
    out2 = jax.block_until_ready(din_forward(target_id2, clk_sequence2, params))
    ref2 = din_forward_ref(target_id2, clk_sequence2, params)
    assert out2.shape == (B2, 1)
    assert jnp.allclose(out2, ref2, rtol=1e-4, atol=2e-5), float(jnp.max(jnp.abs(out2 - ref2)))

    print("KERNEL_OK")
</pallas_src>

<mosaic_0001>
module attributes {stable_mosaic.version = 11 : i64} {
  func.func @_din_kernel(%arg0: i32, %arg1: memref<1x2xi32, #tpu.memory_space<vmem>>, %arg2: memref<8x2xi32, #tpu.memory_space<vmem>>, %arg3: memref<24x512xbf16, #tpu.memory_space<vmem>>, %arg4: memref<24x512xbf16, #tpu.memory_space<vmem>>, %arg5: memref<8x8xf32, #tpu.memory_space<vmem>>, %arg6: memref<8x1xf32, #tpu.memory_space<vmem>>, %arg7: memref<64x8xf32, #tpu.memory_space<vmem>>, %arg8: memref<64x8xf32, #tpu.memory_space<vmem>>, %arg9: memref<64x1xf32, #tpu.memory_space<vmem>>, %arg10: memref<32x64xf32, #tpu.memory_space<vmem>>, %arg11: memref<32x1xf32, #tpu.memory_space<vmem>>, %arg12: memref<1x32xf32, #tpu.memory_space<vmem>>, %arg13: memref<1x1xf32, #tpu.memory_space<vmem>>, %arg14: memref<1x2xf32, #tpu.memory_space<vmem>>) attributes {dimension_semantics = [#tpu.dimension_semantics<parallel>], iteration_bounds = array<i64: 1>, scalar_prefetch = 0 : i64, scratch_operands = 0 : i64, tpu.core_type = #tpu.core_type<tc>, window_params = [{transform_indices = @transform_0, window_bounds = array<i64: 1, 2>}, {transform_indices = @transform_1, window_bounds = array<i64: 8, 2>}, {pipeline_mode = #tpu.pipeline_mode<synchronous>, transform_indices = @transform_2, window_bounds = array<i64: 24, 512>}, {pipeline_mode = #tpu.pipeline_mode<synchronous>, transform_indices = @transform_3, window_bounds = array<i64: 24, 512>}, {pipeline_mode = #tpu.pipeline_mode<synchronous>, transform_indices = @transform_4, window_bounds = array<i64: 8, 8>}, {pipeline_mode = #tpu.pipeline_mode<synchronous>, transform_indices = @transform_5, window_bounds = array<i64: 8, 1>}, {pipeline_mode = #tpu.pipeline_mode<synchronous>, transform_indices = @transform_6, window_bounds = array<i64: 64, 8>}, {pipeline_mode = #tpu.pipeline_mode<synchronous>, transform_indices = @transform_7, window_bounds = array<i64: 64, 8>}, {pipeline_mode = #tpu.pipeline_mode<synchronous>, transform_indices = @transform_8, window_bounds = array<i64: 64, 1>}, {pipeline_mode = #tpu.pipeline_mode<synchronous>, transform_indices = @transform_9, window_bounds = array<i64: 32, 64>}, {pipeline_mode = #tpu.pipeline_mode<synchronous>, transform_indices = @transform_10, window_bounds = array<i64: 32, 1>}, {pipeline_mode = #tpu.pipeline_mode<synchronous>, transform_indices = @transform_11, window_bounds = array<i64: 1, 32>}, {pipeline_mode = #tpu.pipeline_mode<synchronous>, transform_indices = @transform_12, window_bounds = array<i64: 1, 1>}, {transform_indices = @transform_13, window_bounds = array<i64: 1, 2>}]} {
    %c0 = arith.constant 0 : index
    %c0_0 = arith.constant 0 : index
    %0 = vector.load %arg3[%c0, %c0_0] : memref<24x512xbf16, #tpu.memory_space<vmem>>, vector<24x512xbf16>
    %c0_1 = arith.constant 0 : index
    %c0_2 = arith.constant 0 : index
    %1 = vector.load %arg4[%c0_1, %c0_2] : memref<24x512xbf16, #tpu.memory_space<vmem>>, vector<24x512xbf16>
    %c0_3 = arith.constant 0 : index
    %c0_4 = arith.constant 0 : index
    %2 = vector.load %arg1[%c0_3, %c0_4] : memref<1x2xi32, #tpu.memory_space<vmem>>, vector<1x2xi32>
    %3 = tpu.iota {dimensions = array<i32: 0>} : vector<512x2xi32>
    %4 = vector.broadcast %2 : vector<1x2xi32> to vector<512x2xi32>
    %5 = arith.cmpi eq, %3, %4 : vector<512x2xi32>
    %6 = arith.extui %5 : vector<512x2xi1> to vector<512x2xi32>
    %7 = arith.sitofp %6 : vector<512x2xi32> to vector<512x2xf32>
    %8 = arith.truncf %7 : vector<512x2xf32> to vector<512x2xbf16>
    %cst = arith.constant dense<0.000000e+00> : vector<24x2xf32>
    %9 = tpu.matmul %0, %8, %cst {dimension_numbers = #tpu.dot_dimension_numbers<[1], [0], [0], [1], [0, 0, 1, 1], [], []>} : vector<24x512xbf16>, vector<512x2xbf16>, vector<24x2xf32> -> vector<24x2xf32>
    %10 = vector.extract_strided_slice %9 {offsets = [0, 0], sizes = [8, 2], strides = [1, 1]} : vector<24x2xf32> to vector<8x2xf32>
    %11 = vector.extract_strided_slice %9 {offsets = [8, 0], sizes = [8, 2], strides = [1, 1]} : vector<24x2xf32> to vector<8x2xf32>
    %12 = arith.addf %10, %11 : vector<8x2xf32>
    %13 = vector.extract_strided_slice %9 {offsets = [16, 0], sizes = [8, 2], strides = [1, 1]} : vector<24x2xf32> to vector<8x2xf32>
    %14 = arith.addf %12, %13 : vector<8x2xf32>
    %cst_5 = arith.constant -1.000000e+30 : f32
    %15 = vector.broadcast %cst_5 : f32 to vector<1x2xf32>
    %cst_6 = arith.constant 0.000000e+00 : f32
    %16 = vector.broadcast %cst_6 : f32 to vector<1x2xf32>
    %cst_7 = arith.constant 0.000000e+00 : f32
    %17 = vector.broadcast %cst_7 : f32 to vector<8x2xf32>
    %c0_i32 = arith.constant 0 : i32
    %c8_i32 = arith.constant 8 : i32
    %18 = arith.addi %c0_i32, %c8_i32 : i32
    %c1_i32 = arith.constant 1 : i32
    %19:3 = scf.for %arg15 = %c0_i32 to %18 step %c1_i32 iter_args(%arg16 = %15, %arg17 = %16, %arg18 = %17) -> (vector<1x2xf32>, vector<1x2xf32>, vector<8x2xf32>)  : i32 {
      %49 = arith.index_cast %arg15 : i32 to index
      %c0_34 = arith.constant 0 : index
      %50 = vector.load %arg2[%49, %c0_34] : memref<8x2xi32, #tpu.memory_space<vmem>>, vector<1x2xi32>
      %51 = tpu.iota {dimensions = array<i32: 0>} : vector<512x2xi32>
      %52 = vector.broadcast %50 : vector<1x2xi32> to vector<512x2xi32>
      %53 = arith.cmpi eq, %51, %52 : vector<512x2xi32>
      %54 = arith.extui %53 : vector<512x2xi1> to vector<512x2xi32>
      %55 = arith.sitofp %54 : vector<512x2xi32> to vector<512x2xf32>
      %56 = arith.truncf %55 : vector<512x2xf32> to vector<512x2xbf16>
      %cst_35 = arith.constant dense<0.000000e+00> : vector<24x2xf32>
      %57 = tpu.matmul %1, %56, %cst_35 {dimension_numbers = #tpu.dot_dimension_numbers<[1], [0], [0], [1], [0, 0, 1, 1], [], []>} : vector<24x512xbf16>, vector<512x2xbf16>, vector<24x2xf32> -> vector<24x2xf32>
      %58 = vector.extract_strided_slice %57 {offsets = [0, 0], sizes = [8, 2], strides = [1, 1]} : vector<24x2xf32> to vector<8x2xf32>
      %59 = vector.extract_strided_slice %57 {offsets = [8, 0], sizes = [8, 2], strides = [1, 1]} : vector<24x2xf32> to vector<8x2xf32>
      %60 = arith.addf %58, %59 : vector<8x2xf32>
      %61 = vector.extract_strided_slice %57 {offsets = [16, 0], sizes = [8, 2], strides = [1, 1]} : vector<24x2xf32> to vector<8x2xf32>
      %62 = arith.addf %60, %61 : vector<8x2xf32>
      %63 = arith.mulf %62, %14 : vector<8x2xf32>
      %cst_36 = arith.constant dense<0.000000e+00> : vector<2xf32>
      %64 = vector.multi_reduction <add>, %63, %cst_36 [0] : vector<8x2xf32> to vector<2xf32>
      %65 = vector.shape_cast %64 : vector<2xf32> to vector<1x2xf32>
      %cst_37 = arith.constant 0.353553385 : f32
      %66 = vector.broadcast %cst_37 : f32 to vector<1x2xf32>
      %67 = arith.mulf %65, %66 : vector<1x2xf32>
      %c0_i32_38 = arith.constant 0 : i32
      %68 = vector.broadcast %c0_i32_38 : i32 to vector<1x2xi32>
      %69 = arith.cmpi ne, %50, %68 : vector<1x2xi32>
      %cst_39 = arith.constant -1.000000e+09 : f32
      %70 = vector.broadcast %cst_39 : f32 to vector<1x2xf32>
      %71 = arith.select %69, %67, %70 : vector<1x2xi1>, vector<1x2xf32>
      %72 = arith.maximumf %arg16, %71 : vector<1x2xf32>
      %73 = arith.subf %arg16, %72 : vector<1x2xf32>
      %74 = math.exp %73 : vector<1x2xf32>
      %75 = arith.subf %71, %72 : vector<1x2xf32>
      %76 = math.exp %75 : vector<1x2xf32>
      %77 = arith.mulf %74, %arg17 : vector<1x2xf32>
      %78 = arith.addf %77, %76 : vector<1x2xf32>
      %79 = vector.broadcast %74 : vector<1x2xf32> to vector<8x2xf32>
      %80 = arith.mulf %79, %arg18 : vector<8x2xf32>
      %81 = vector.broadcast %76 : vector<1x2xf32> to vector<8x2xf32>
      %82 = arith.mulf %81, %62 : vector<8x2xf32>
      %83 = arith.addf %80, %82 : vector<8x2xf32>
      scf.yield %72, %78, %83 : vector<1x2xf32>, vector<1x2xf32>, vector<8x2xf32>
    }
    %c8_i32_8 = arith.constant 8 : i32
    %20 = vector.broadcast %19#1 : vector<1x2xf32> to vector<8x2xf32>
    %21 = arith.divf %19#2, %20 : vector<8x2xf32>
    %c0_9 = arith.constant 0 : index
    %c0_10 = arith.constant 0 : index
    %22 = vector.load %arg5[%c0_9, %c0_10] : memref<8x8xf32, #tpu.memory_space<vmem>>, vector<8x8xf32>
    %cst_11 = arith.constant dense<0.000000e+00> : vector<8x2xf32>
    %23 = tpu.matmul %22, %21, %cst_11 {dimension_numbers = #tpu.dot_dimension_numbers<[1], [0], [0], [1], [0, 0, 1, 1], [], []>} : vector<8x8xf32>, vector<8x2xf32>, vector<8x2xf32> -> vector<8x2xf32>
    %c0_12 = arith.constant 0 : index
    %c0_13 = arith.constant 0 : index
    %24 = vector.load %arg6[%c0_12, %c0_13] : memref<8x1xf32, #tpu.memory_space<vmem>>, vector<8x1xf32>
    %25 = vector.broadcast %24 : vector<8x1xf32> to vector<8x2xf32>
    %26 = arith.addf %23, %25 : vector<8x2xf32>
    %27 = math.tanh %26 : vector<8x2xf32>
    %c0_14 = arith.constant 0 : index
    %c0_15 = arith.constant 0 : index
    %28 = vector.load %arg7[%c0_14, %c0_15] : memref<64x8xf32, #tpu.memory_space<vmem>>, vector<64x8xf32>
    %cst_16 = arith.constant dense<0.000000e+00> : vector<64x2xf32>
    %29 = tpu.matmul %28, %14, %cst_16 {dimension_numbers = #tpu.dot_dimension_numbers<[1], [0], [0], [1], [0, 0, 1, 1], [], []>} : vector<64x8xf32>, vector<8x2xf32>, vector<64x2xf32> -> vector<64x2xf32>
    %c0_17 = arith.constant 0 : index
    %c0_18 = arith.constant 0 : index
    %30 = vector.load %arg8[%c0_17, %c0_18] : memref<64x8xf32, #tpu.memory_space<vmem>>, vector<64x8xf32>
    %cst_19 = arith.constant dense<0.000000e+00> : vector<64x2xf32>
    %31 = tpu.matmul %30, %27, %cst_19 {dimension_numbers = #tpu.dot_dimension_numbers<[1], [0], [0], [1], [0, 0, 1, 1], [], []>} : vector<64x8xf32>, vector<8x2xf32>, vector<64x2xf32> -> vector<64x2xf32>
    %32 = arith.addf %29, %31 : vector<64x2xf32>
    %c0_20 = arith.constant 0 : index
    %c0_21 = arith.constant 0 : index
    %33 = vector.load %arg9[%c0_20, %c0_21] : memref<64x1xf32, #tpu.memory_space<vmem>>, vector<64x1xf32>
    %34 = vector.broadcast %33 : vector<64x1xf32> to vector<64x2xf32>
    %35 = arith.addf %32, %34 : vector<64x2xf32>
    %36 = math.tanh %35 : vector<64x2xf32>
    %c0_22 = arith.constant 0 : index
    %c0_23 = arith.constant 0 : index
    %37 = vector.load %arg10[%c0_22, %c0_23] : memref<32x64xf32, #tpu.memory_space<vmem>>, vector<32x64xf32>
    %cst_24 = arith.constant dense<0.000000e+00> : vector<32x2xf32>
    %38 = tpu.matmul %37, %36, %cst_24 {dimension_numbers = #tpu.dot_dimension_numbers<[1], [0], [0], [1], [0, 0, 1, 1], [], []>} : vector<32x64xf32>, vector<64x2xf32>, vector<32x2xf32> -> vector<32x2xf32>
    %c0_25 = arith.constant 0 : index
    %c0_26 = arith.constant 0 : index
    %39 = vector.load %arg11[%c0_25, %c0_26] : memref<32x1xf32, #tpu.memory_space<vmem>>, vector<32x1xf32>
    %40 = vector.broadcast %39 : vector<32x1xf32> to vector<32x2xf32>
    %41 = arith.addf %38, %40 : vector<32x2xf32>
    %42 = math.tanh %41 : vector<32x2xf32>
    %c0_27 = arith.constant 0 : index
    %c0_28 = arith.constant 0 : index
    %43 = vector.load %arg12[%c0_27, %c0_28] : memref<1x32xf32, #tpu.memory_space<vmem>>, vector<1x32xf32>
    %cst_29 = arith.constant dense<0.000000e+00> : vector<1x2xf32>
    %44 = tpu.matmul %43, %42, %cst_29 {dimension_numbers = #tpu.dot_dimension_numbers<[1], [0], [0], [1], [0, 0, 1, 1], [], []>} : vector<1x32xf32>, vector<32x2xf32>, vector<1x2xf32> -> vector<1x2xf32>
    %c0_30 = arith.constant 0 : index
    %c0_31 = arith.constant 0 : index
    %45 = vector.load %arg13[%c0_30, %c0_31] : memref<1x1xf32, #tpu.memory_space<vmem>>, vector<1x1xf32>
    %46 = vector.broadcast %45 : vector<1x1xf32> to vector<1x2xf32>
    %47 = arith.addf %44, %46 : vector<1x2xf32>
    %c0_32 = arith.constant 0 : index
    %c0_33 = arith.constant 0 : index
    %48 = vector.load %arg14[%c0_32, %c0_33] : memref<1x2xf32, #tpu.memory_space<vmem>>, vector<1x2xf32>
    tpu.vector_store %arg14[%c0_32, %c0_33], %47 {strides = array<i32>} : memref<1x2xf32, #tpu.memory_space<vmem>>, vector<1x2xf32>,
    return
  }
  func.func @transform_0(%arg0: i32) -> (i32, i32) {
    %c0_i32 = arith.constant 0 : i32
    %c0_i32_0 = arith.constant 0 : i32
    return %c0_i32, %arg0 : i32, i32
  }
  func.func @transform_1(%arg0: i32) -> (i32, i32) {
    %c0_i32 = arith.constant 0 : i32
    %c0_i32_0 = arith.constant 0 : i32
    return %c0_i32, %arg0 : i32, i32
  }
  func.func @transform_2(%arg0: i32) -> (i32, i32) {
    %c0_i32 = arith.constant 0 : i32
    %c0_i32_0 = arith.constant 0 : i32
    %c0_i32_1 = arith.constant 0 : i32
    return %c0_i32, %c0_i32_0 : i32, i32
  }
  func.func @transform_3(%arg0: i32) -> (i32, i32) {
    %c0_i32 = arith.constant 0 : i32
    %c0_i32_0 = arith.constant 0 : i32
    %c0_i32_1 = arith.constant 0 : i32
    return %c0_i32, %c0_i32_0 : i32, i32
  }
  func.func @transform_4(%arg0: i32) -> (i32, i32) {
    %c0_i32 = arith.constant 0 : i32
    %c0_i32_0 = arith.constant 0 : i32
    %c0_i32_1 = arith.constant 0 : i32
    return %c0_i32, %c0_i32_0 : i32, i32
  }
  func.func @transform_5(%arg0: i32) -> (i32, i32) {
    %c0_i32 = arith.constant 0 : i32
    %c0_i32_0 = arith.constant 0 : i32
    %c0_i32_1 = arith.constant 0 : i32
    return %c0_i32, %c0_i32_0 : i32, i32
  }
  func.func @transform_6(%arg0: i32) -> (i32, i32) {
    %c0_i32 = arith.constant 0 : i32
    %c0_i32_0 = arith.constant 0 : i32
    %c0_i32_1 = arith.constant 0 : i32
    return %c0_i32, %c0_i32_0 : i32, i32
  }
  func.func @transform_7(%arg0: i32) -> (i32, i32) {
    %c0_i32 = arith.constant 0 : i32
    %c0_i32_0 = arith.constant 0 : i32
    %c0_i32_1 = arith.constant 0 : i32
    return %c0_i32, %c0_i32_0 : i32, i32
  }
  func.func @transform_8(%arg0: i32) -> (i32, i32) {
    %c0_i32 = arith.constant 0 : i32
    %c0_i32_0 = arith.constant 0 : i32
    %c0_i32_1 = arith.constant 0 : i32
    return %c0_i32, %c0_i32_0 : i32, i32
  }
  func.func @transform_9(%arg0: i32) -> (i32, i32) {
    %c0_i32 = arith.constant 0 : i32
    %c0_i32_0 = arith.constant 0 : i32
    %c0_i32_1 = arith.constant 0 : i32
    return %c0_i32, %c0_i32_0 : i32, i32
  }
  func.func @transform_10(%arg0: i32) -> (i32, i32) {
    %c0_i32 = arith.constant 0 : i32
    %c0_i32_0 = arith.constant 0 : i32
    %c0_i32_1 = arith.constant 0 : i32
    return %c0_i32, %c0_i32_0 : i32, i32
  }
  func.func @transform_11(%arg0: i32) -> (i32, i32) {
    %c0_i32 = arith.constant 0 : i32
    %c0_i32_0 = arith.constant 0 : i32
    %c0_i32_1 = arith.constant 0 : i32
    return %c0_i32, %c0_i32_0 : i32, i32
  }
  func.func @transform_12(%arg0: i32) -> (i32, i32) {
    %c0_i32 = arith.constant 0 : i32
    %c0_i32_0 = arith.constant 0 : i32
    %c0_i32_1 = arith.constant 0 : i32
    return %c0_i32, %c0_i32_0 : i32, i32
  }
  func.func @transform_13(%arg0: i32) -> (i32, i32) {
    %c0_i32 = arith.constant 0 : i32
    %c0_i32_0 = arith.constant 0 : i32
    return %c0_i32, %arg0 : i32, i32
  }
}

</mosaic_0001>

<bundles_post_ra>
// kernel: tpu_custom_call.1
= control target key start
LH: loop header
LB: loop body
LE: loop exit
PB: predicated region body
PF: predicated region fallthrough
CT: control target
= control target key end

     0   :  { %s3144_s0 = inlined_call_operand.vmem [shape: s32[1,2], index: 0, kind: input, shape index: {}]   ;;  %s3145_s1 = inlined_call_operand.vmem [shape: s32[8,2], index: 1, kind: input, shape index: {}]   ;;  %s3146_s2 = inlined_call_operand.vmem [shape: bf16[24,512], index: 2, kind: input, shape index: {}]   ;;  %s3147_s3 = inlined_call_operand.vmem [shape: bf16[24,512], index: 3, kind: input, shape index: {}]   ;;  %s3148_s4 = inlined_call_operand.vmem [shape: f32[8,8], index: 4, kind: input, shape index: {}]   ;;  %s3149_s5 = inlined_call_operand.vmem [shape: f32[8,1], index: 5, kind: input, shape index: {}]   ;;  %s3150_s6 = inlined_call_operand.vmem [shape: f32[64,8], index: 6, kind: input, shape index: {}]   ;;  %s3151_s7 = inlined_call_operand.vmem [shape: f32[64,8], index: 7, kind: input, shape index: {}]   ;;  %s3152_s8 = inlined_call_operand.vmem [shape: f32[64,1], index: 8, kind: input, shape index: {}]   ;;  %s3153_s9 = inlined_call_operand.vmem [shape: f32[32,64], index: 9, kind: input, shape index: {}]   ;;  %s3154_s10 = inlined_call_operand.vmem [shape: f32[32,1], index: 10, kind: input, shape index: {}]   ;;  %s3155_s11 = inlined_call_operand.vmem [shape: f32[1,32], index: 11, kind: input, shape index: {}]   ;;  %s3156_s12 = inlined_call_operand.<no memory space> [shape: f32[1,1], index: 12, kind: input, shape index: {}]   ;;  %s3157_s13 = inlined_call_operand.hbm [shape: f32[1,2], index: 13, kind: output, shape index: {}]  }
   0x1   :  { %v18_v0 = vstv %s3156_s12 }
   0x2   :  { %19 = vst [vmem:[#allocation2] sm:$0x1] %v18_v0 }
   0x3   :  { %20 = vsyncpa [#allocation4], 0  ;;  %v2323_v1 = vld [vmem:[%s3147_s3] sm:$0xff]  ;;  %v2328_v2 = vld [vmem:[%s3147_s3 + $0x8] sm:$0xff]  ;;  %v61_v3 = vlaneseq  ;;  %v2240_v20 = vmov 1.0|1.0  }
   0x4   :  { %3197 = vst [vmem:[#allocation6_spill] sm:$0xff] %v2323_v1  ;;  %3198 = vst [vmem:[#allocation7_spill] sm:$0xff] %v2328_v2  ;;  %v2333_v4 = vld [vmem:[%s3147_s3 + $0x10] sm:$0xff]  ;;  %v2338_v5 = vld [vmem:[%s3147_s3 + $0x18] sm:$0xff] }
   0x5   :  { %3199 = vst [vmem:[#allocation8_spill] sm:$0xff] %v2333_v4  ;;  %3200 = vst [vmem:[#allocation9_spill] sm:$0xff] %v2338_v5  ;;  %v2343_v6 = vld [vmem:[%s3147_s3 + $0x20] sm:$0xff]  ;;  %v2348_v7 = vld [vmem:[%s3147_s3 + $0x28] sm:$0xff]  ;;  %v2355_v9 = vshrl.u32 %v61_v3, 7 }
   0x6   :  { %3201 = vst [vmem:[#allocation10_spill] sm:$0xff] %v2343_v6  ;;  %3202 = vst [vmem:[#allocation11_spill] sm:$0xff] %v2348_v7  ;;  %v2353_v8 = vld [vmem:[%s3144_s0] ss:$0 sm:$0xff]  ;;  %v2142_v10 = vld [vmem:[%s3146_s2 + $0x4] ss:$16 sps:$4 sm:$0xff]  }
   0x7   :  { %3203 = vst [vmem:[#allocation12_spill] sm:$0xff] %v2355_v9  ;;  %v2361_v11 = vadd.s32 128, %v2355_v9  ;;  %v2364_v12 = vadd.s32 136, %v2355_v9  ;;  %v2367_v13 = vadd.s32 384, %v2355_v9  ;;  %v2370_v14 = vadd.s32 392, %v2355_v9  ;;  %420 = vmatprep.mubr.bf16.mxu0 %v2142_v10 }
   0x8   :  { %v2373_v15 = vadd.s32 8, %v2355_v9  ;;  %vm130_vm0 = vcmp.eq.s32.totalorder %v2355_v9, %v2353_v8  ;;  %v2378_v16 = vadd.s32 256, %v2355_v9  ;;  %v2381_v17 = vadd.s32 264, %v2355_v9  ;;  %v2145_v18 = vld [vmem:[%s3146_s2 + $0xc] ss:$16 sps:$4 sm:$0xff]  }
   0x9   :  { %3204 = vst [vmem:[#allocation13_spill] sm:$0xff] %v2361_v11  ;;  %3205 = vst [vmem:[#allocation14_spill] sm:$0xff] %v2364_v12  ;;  %vm146_vm1 = vcmp.eq.s32.totalorder %v2361_v11, %v2353_v8  ;;  %vm147_vm2 = vcmp.eq.s32.totalorder %v2364_v12, %v2353_v8  ;;  %vm178_vm3 = vcmp.eq.s32.totalorder %v2367_v13, %v2353_v8  ;;  %v2401_v19 = vadd.s32 144, %v2355_v9 }
   0xa   :  { %3206 = vst [vmem:[#allocation15_spill] sm:$0xff] %v2367_v13  ;;  %vm179_vm4 = vcmp.eq.s32.totalorder %v2370_v14, %v2353_v8  ;;  %vm1650_vm5 = vmpackc.low %vm147_vm2, %vm146_vm1  ;;  %vm131_vm6 = vcmp.eq.s32.totalorder %v2373_v15, %v2353_v8  ;;  %vm162_vm7 = vcmp.eq.s32.totalorder %v2378_v16, %v2353_v8  ;;  %vm163_vm8 = vcmp.eq.s32.totalorder %v2381_v17, %v2353_v8 }
   0xb   :  { %1856 = vmatprep.subr.msk.bf16.mxu0 %vm1650_vm5, %v2240_v20  ;;  %vm1682_vm9 = vmpackc.low %vm179_vm4, %vm178_vm3  ;;  %v2405_v21 = vadd.s32 152, %v2355_v9  ;;  %v2408_v22 = vadd.s32 400, %v2355_v9  ;;  %v2411_v23 = vadd.s32 408, %v2355_v9  ;;  %v2414_v24 = vadd.s32 16, %v2355_v9  ;;  %468 = vmatprep.mubr.bf16.mxu1 %v2145_v18 }
   0xc   :  { %1884 = vmatprep.subr.msk.bf16.mxu1 %vm1682_vm9, %v2240_v20  ;;  %vm1634_vm10 = vmpackc.low %vm131_vm6, %vm130_vm0  ;;  %vm148_vm11 = vcmp.eq.s32.totalorder %v2401_v19, %v2353_v8  ;;  %v2423_v25 = vadd.s32 24, %v2355_v9  ;;  %v2426_v26 = vadd.s32 272, %v2355_v9  ;;  %v2429_v27 = vadd.s32 280, %v2355_v9 }
   0xd   :  { %1857 = vmatpush3.bf16.msk.msra.mxu0 %vm1634_vm10, %v2240_v20  ;;  %vm1666_vm12 = vmpackc.low %vm163_vm8, %vm162_vm7  ;;  %vm149_vm13 = vcmp.eq.s32.totalorder %v2405_v21, %v2353_v8  ;;  %vm180_vm14 = vcmp.eq.s32.totalorder %v2408_v22, %v2353_v8  ;;  %vm181_vm15 = vcmp.eq.s32.totalorder %v2411_v23, %v2353_v8  ;;  %vm132_vm0 = vcmp.eq.s32.totalorder %v2414_v24, %v2353_v8 }
   0xe   :  { %1885 = vmatpush3.bf16.msk.msra.mxu1 %vm1666_vm12, %v2240_v20  ;;  %vm1652_vm1 = vmpackc.low %vm149_vm13, %vm148_vm11  ;;  %vm133_vm2 = vcmp.eq.s32.totalorder %v2423_v25, %v2353_v8  ;;  %vm164_vm3 = vcmp.eq.s32.totalorder %v2426_v26, %v2353_v8  ;;  %vm165_vm4 = vcmp.eq.s32.totalorder %v2429_v27, %v2353_v8  ;;  %v2454_v28 = vadd.s32 160, %v2355_v9 }
   0xf   :  { %1858 = vmatprep.subr.msk.bf16.mxu0 %vm1652_vm1, %v2240_v20  ;;  %vm1684_vm5 = vmpackc.low %vm181_vm15, %vm180_vm14  ;;  %v2458_v29 = vadd.s32 168, %v2355_v9  ;;  %v2461_v30 = vadd.s32 416, %v2355_v9  ;;  %v2464_v31 = vadd.s32 424, %v2355_v9  ;;  %v2467_v32 = vadd.s32 32, %v2355_v9 }
  0x10   :  { %1886 = vmatprep.subr.msk.bf16.mxu1 %vm1684_vm5, %v2240_v20  ;;  %vm1636_vm6 = vmpackc.low %vm133_vm2, %vm132_vm0  ;;  %vm150_vm7 = vcmp.eq.s32.totalorder %v2454_v28, %v2353_v8  ;;  %v2473_v33 = vadd.s32 40, %v2355_v9  ;;  %v2476_v34 = vadd.s32 288, %v2355_v9  ;;  %v2479_v35 = vadd.s32 296, %v2355_v9 }
  0x11   :  { %1859 = vmatpush3.bf16.msk.msra.mxu0 %vm1636_vm6, %v2240_v20  ;;  %vm1668_vm8 = vmpackc.low %vm165_vm4, %vm164_vm3  ;;  %vm151_vm9 = vcmp.eq.s32.totalorder %v2458_v29, %v2353_v8  ;;  %vm182_vm10 = vcmp.eq.s32.totalorder %v2461_v30, %v2353_v8  ;;  %vm183_vm11 = vcmp.eq.s32.totalorder %v2464_v31, %v2353_v8  ;;  %vm134_vm12 = vcmp.eq.s32.totalorder %v2467_v32, %v2353_v8 }
  0x12   :  { %1887 = vmatpush3.bf16.msk.msra.mxu1 %vm1668_vm8, %v2240_v20  ;;  %vm1654_vm13 = vmpackc.low %vm151_vm9, %vm150_vm7  ;;  %vm135_vm14 = vcmp.eq.s32.totalorder %v2473_v33, %v2353_v8  ;;  %vm166_vm15 = vcmp.eq.s32.totalorder %v2476_v34, %v2353_v8  ;;  %vm167_vm0 = vcmp.eq.s32.totalorder %v2479_v35, %v2353_v8  ;;  %v2504_v36 = vadd.s32 176, %v2355_v9 }
  0x13   :  { %1860 = vmatprep.subr.msk.bf16.mxu0 %vm1654_vm13, %v2240_v20  ;;  %vm1686_vm1 = vmpackc.low %vm183_vm11, %vm182_vm10  ;;  %v2508_v37 = vadd.s32 184, %v2355_v9  ;;  %v2511_v38 = vadd.s32 432, %v2355_v9  ;;  %v2514_v39 = vadd.s32 440, %v2355_v9  ;;  %v2517_v40 = vadd.s32 48, %v2355_v9 }
  0x14   :  { %1888 = vmatprep.subr.msk.bf16.mxu1 %vm1686_vm1, %v2240_v20  ;;  %vm1638_vm2 = vmpackc.low %vm135_vm14, %vm134_vm12  ;;  %vm152_vm3 = vcmp.eq.s32.totalorder %v2504_v36, %v2353_v8  ;;  %v2523_v41 = vadd.s32 56, %v2355_v9  ;;  %v2526_v42 = vadd.s32 304, %v2355_v9  ;;  %v2529_v43 = vadd.s32 312, %v2355_v9 }
  0x15   :  { %1861 = vmatpush3.bf16.msk.msra.mxu0 %vm1638_vm2, %v2240_v20  ;;  %vm1670_vm4 = vmpackc.low %vm167_vm0, %vm166_vm15  ;;  %vm153_vm5 = vcmp.eq.s32.totalorder %v2508_v37, %v2353_v8  ;;  %vm184_vm6 = vcmp.eq.s32.totalorder %v2511_v38, %v2353_v8  ;;  %vm185_vm7 = vcmp.eq.s32.totalorder %v2514_v39, %v2353_v8  ;;  %vm136_vm8 = vcmp.eq.s32.totalorder %v2517_v40, %v2353_v8 }
  0x16   :  { %1889 = vmatpush3.bf16.msk.msra.mxu1 %vm1670_vm4, %v2240_v20  ;;  %vm1656_vm9 = vmpackc.low %vm153_vm5, %vm152_vm3  ;;  %vm137_vm10 = vcmp.eq.s32.totalorder %v2523_v41, %v2353_v8  ;;  %vm168_vm11 = vcmp.eq.s32.totalorder %v2526_v42, %v2353_v8  ;;  %vm169_vm12 = vcmp.eq.s32.totalorder %v2529_v43, %v2353_v8  ;;  %v2554_v44 = vadd.s32 192, %v2355_v9 }
  0x17   :  { %1862 = vmatprep.subr.msk.bf16.mxu0 %vm1656_vm9, %v2240_v20  ;;  %vm1688_vm13 = vmpackc.low %vm185_vm7, %vm184_vm6  ;;  %v2558_v45 = vadd.s32 200, %v2355_v9  ;;  %v2561_v46 = vadd.s32 448, %v2355_v9  ;;  %v2564_v47 = vadd.s32 456, %v2355_v9  ;;  %v2567_v48 = vadd.s32 64, %v2355_v9 }
  0x18   :  { %1890 = vmatprep.subr.msk.bf16.mxu1 %vm1688_vm13, %v2240_v20  ;;  %vm1640_vm14 = vmpackc.low %vm137_vm10, %vm136_vm8  ;;  %vm154_vm15 = vcmp.eq.s32.totalorder %v2554_v44, %v2353_v8  ;;  %v2573_v49 = vadd.s32 72, %v2355_v9  ;;  %v2576_v50 = vadd.s32 320, %v2355_v9  ;;  %v2579_v51 = vadd.s32 328, %v2355_v9 }
  0x19   :  { %3207 = vst [vmem:[#allocation16_spill] sm:$0xff] %v2567_v48  ;;  %1863 = vmatpush3.bf16.msk.msra.mxu0 %vm1640_vm14, %v2240_v20  ;;  %vm1672_vm0 = vmpackc.low %vm169_vm12, %vm168_vm11  ;;  %vm155_vm1 = vcmp.eq.s32.totalorder %v2558_v45, %v2353_v8  ;;  %vm186_vm2 = vcmp.eq.s32.totalorder %v2561_v46, %v2353_v8  ;;  %vm187_vm3 = vcmp.eq.s32.totalorder %v2564_v47, %v2353_v8  ;;  %v2604_v52 = vadd.s32 208, %v2355_v9 }
  0x1a   :  { %3208 = vst [vmem:[#allocation17_spill] sm:$0xff] %v2573_v49  ;;  %3209 = vst [vmem:[#allocation18_spill] sm:$0xff] %v2576_v50  ;;  %vm138_vm4 = vcmp.eq.s32.totalorder %v2567_v48, %v2353_v8  ;;  %1891 = vmatpush3.bf16.msk.msra.mxu1 %vm1672_vm0, %v2240_v20  ;;  %vm139_vm6 = vcmp.eq.s32.totalorder %v2573_v49, %v2353_v8  ;;  %vm170_vm7 = vcmp.eq.s32.totalorder %v2576_v50, %v2353_v8 }
  0x1b   :  { %3210 = vst [vmem:[#allocation19_spill] sm:$0xff] %v2579_v51  ;;  %vm1658_vm5 = vmpackc.low %vm155_vm1, %vm154_vm15  ;;  %vm171_vm8 = vcmp.eq.s32.totalorder %v2579_v51, %v2353_v8  ;;  %v2608_v53 = vadd.s32 216, %v2355_v9  ;;  %v2611_v54 = vadd.s32 464, %v2355_v9  ;;  %v2614_v55 = vadd.s32 472, %v2355_v9 }
  0x1c   :  { %3211 = vst [vmem:[#allocation20_spill] sm:$0xff] %v2604_v52  ;;  %1864 = vmatprep.subr.msk.bf16.mxu0 %vm1658_vm5, %v2240_v20  ;;  %vm1690_vm9 = vmpackc.low %vm187_vm3, %vm186_vm2  ;;  %v2617_v56 = vadd.s32 80, %v2355_v9  ;;  %vm156_vm11 = vcmp.eq.s32.totalorder %v2604_v52, %v2353_v8  ;;  %v2623_v57 = vadd.s32 88, %v2355_v9  ;;  %v2626_v58 = vadd.s32 336, %v2355_v9 }
  0x1d   :  { %3212 = vst [vmem:[#allocation21_spill] sm:$0xff] %v2608_v53  ;;  %3213 = vst [vmem:[#allocation22_spill] sm:$0xff] %v2611_v54  ;;  %1892 = vmatprep.subr.msk.bf16.mxu1 %vm1690_vm9, %v2240_v20  ;;  %v2629_v59 = vadd.s32 344, %v2355_v9  ;;  %vm157_vm13 = vcmp.eq.s32.totalorder %v2608_v53, %v2353_v8  ;;  %vm188_vm14 = vcmp.eq.s32.totalorder %v2611_v54, %v2353_v8  ;;  %v2654_v60 = vadd.s32 224, %v2355_v9 }
  0x1e   :  { %3214 = vst [vmem:[#allocation23_spill] sm:$0xff] %v2614_v55  ;;  %3215 = vst [vmem:[#allocation24_spill] sm:$0xff] %v2617_v56  ;;  %vm189_vm15 = vcmp.eq.s32.totalorder %v2614_v55, %v2353_v8  ;;  %vm140_vm0 = vcmp.eq.s32.totalorder %v2617_v56, %v2353_v8  ;;  %vm141_vm2 = vcmp.eq.s32.totalorder %v2623_v57, %v2353_v8  ;;  %v2658_v61 = vadd.s32 232, %v2355_v9 }
  0x1f   :  { %vm1642_vm10 = vmpackc.low %vm139_vm6, %vm138_vm4  ;;  %3216 = vst [vmem:[#allocation25_spill] sm:$0xff] %v2623_v57  ;;  %vm172_vm3 = vcmp.eq.s32.totalorder %v2626_v58, %v2353_v8  ;;  %vm173_vm4 = vcmp.eq.s32.totalorder %v2629_v59, %v2353_v8  ;;  %v2661_v62 = vadd.s32 480, %v2355_v9  ;;  %v2664_v63 = vadd.s32 488, %v2355_v9 }
  0x20   :  { %3217 = vst [vmem:[#allocation26_spill] sm:$0xff] %v2626_v58  ;;  %3218 = vst [vmem:[#allocation27_spill] sm:$0xff] %v2629_v59  ;;  %1865 = vmatpush3.bf16.msk.msra.mxu0 %vm1642_vm10, %v2240_v20  ;;  %v2667_v0 = vadd.s32 96, %v2355_v9  ;;  %v2673_v3 = vadd.s32 104, %v2355_v9  ;;  %v2676_v10 = vadd.s32 352, %v2355_v9  ;;  %v2679_v18 = vadd.s32 360, %v2355_v9 }
  0x21   :  { %vm1674_vm12 = vmpackc.low %vm171_vm8, %vm170_vm7  ;;  %3219 = vst [vmem:[#allocation28_spill] sm:$0xff] %v2654_v60  ;;  %vm158_vm7 = vcmp.eq.s32.totalorder %v2654_v60, %v2353_v8  ;;  %vm159_vm9 = vcmp.eq.s32.totalorder %v2658_v61, %v2353_v8  ;;  %vm190_vm10 = vcmp.eq.s32.totalorder %v2661_v62, %v2353_v8  ;;  %v2704_v7 = vadd.s32 240, %v2355_v9 }
  0x22   :  { %1893 = vmatpush3.bf16.msk.msra.mxu1 %vm1674_vm12, %v2240_v20  ;;  %vm1660_vm1 = vmpackc.low %vm157_vm13, %vm156_vm11  ;;  %3220 = vst [vmem:[#allocation29_spill] sm:$0xff] %v2658_v61  ;;  %vm191_vm11 = vcmp.eq.s32.totalorder %v2664_v63, %v2353_v8  ;;  %vm142_vm12 = vcmp.eq.s32.totalorder %v2667_v0, %v2353_v8  ;;  %v2708_v6 = vadd.s32 248, %v2355_v9  ;;  %v2726_v61 = vadd.s32 368, %v2355_v9 }
  0x23   :  { %1866 = vmatprep.subr.msk.bf16.mxu0 %vm1660_vm1, %v2240_v20  ;;  %vm1692_vm5 = vmpackc.low %vm189_vm15, %vm188_vm14  ;;  %3221 = vst [vmem:[#allocation30_spill] sm:$0xff] %v2661_v62  ;;  %vm143_vm14 = vcmp.eq.s32.totalorder %v2673_v3, %v2353_v8  ;;  %vm174_vm15 = vcmp.eq.s32.totalorder %v2676_v10, %v2353_v8  ;;  %v2723_v62 = vadd.s32 120, %v2355_v9  ;;  %v2729_v60 = vadd.s32 376, %v2355_v9 }
  0x24   :  { %3222 = vst [vmem:[#allocation31_spill] sm:$0xff] %v2664_v63  ;;  %3223 = vst [vmem:[#allocation32_spill] sm:$0xff] %v2667_v0  ;;  %1894 = vmatprep.subr.msk.bf16.mxu1 %vm1692_vm5, %v2240_v20  ;;  %v2711_v0 = vadd.s32 496, %v2355_v9  ;;  %v2717_v63 = vadd.s32 112, %v2355_v9  ;;  %vm161_vm5 = vcmp.eq.s32.totalorder %v2708_v6, %v2353_v8 }
  0x25   :  { %vm1644_vm6 = vmpackc.low %vm141_vm2, %vm140_vm0  ;;  %3224 = vst [vmem:[#allocation33_spill] sm:$0xff] %v2673_v3  ;;  %vm175_vm0 = vcmp.eq.s32.totalorder %v2679_v18, %v2353_v8  ;;  %v2714_v3 = vadd.s32 504, %v2355_v9 }
  0x26   :  { %3225 = vst [vmem:[#allocation34_spill] sm:$0xff] %v2676_v10  ;;  %3226 = vst [vmem:[#allocation35_spill] sm:$0xff] %v2679_v18  ;;  %1867 = vmatpush3.bf16.msk.msra.mxu0 %vm1644_vm6, %v2240_v20  ;;  %vm192_vm6 = vcmp.eq.s32.totalorder %v2711_v0, %v2353_v8 }
  0x27   :  { %vm1676_vm8 = vmpackc.low %vm173_vm4, %vm172_vm3  ;;  %3227 = vst [vmem:[#allocation36_spill] sm:$0xff] %v2704_v7  ;;  %vm160_vm3 = vcmp.eq.s32.totalorder %v2704_v7, %v2353_v8 }
  0x28   :  { %1895 = vmatpush3.bf16.msk.msra.mxu1 %vm1676_vm8, %v2240_v20  ;;  %vm1662_vm13 = vmpackc.low %vm159_vm9, %vm158_vm7  ;;  %3228 = vst [vmem:[#allocation37_spill] sm:$0xff] %v2708_v6  ;;  %vm193_vm7 = vcmp.eq.s32.totalorder %v2714_v3, %v2353_v8  ;;  %vm144_vm8 = vcmp.eq.s32.totalorder %v2717_v63, %v2353_v8 }
  0x29   :  { %1868 = vmatprep.subr.msk.bf16.mxu0 %vm1662_vm13, %v2240_v20  ;;  %vm1694_vm1 = vmpackc.low %vm191_vm11, %vm190_vm10  ;;  %3229 = vst [vmem:[#allocation38_spill] sm:$0xff] %v2711_v0  ;;  %vm145_vm10 = vcmp.eq.s32.totalorder %v2723_v62, %v2353_v8  ;;  %vm176_vm11 = vcmp.eq.s32.totalorder %v2726_v61, %v2353_v8  ;;  %v52_v0 = vld [vmem:[%s3146_s2 + $0x20] sm:$0xff] }
  0x2a   :  { %3230 = vst [vmem:[#allocation39_spill] sm:$0xff] %v2714_v3  ;;  %3231 = vst [vmem:[#allocation40_spill] sm:$0xff] %v2717_v63  ;;  %1896 = vmatprep.subr.msk.bf16.mxu1 %vm1694_vm1, %v2240_v20  ;;  %v53_v63 = vld [vmem:[%s3146_s2 + $0x28] sm:$0xff]  ;;  %v1630_v3 = vcombine.low %v52_v0, %v52_v0 }
  0x2b   :  { %vm1646_vm2 = vmpackc.low %vm143_vm14, %vm142_vm12  ;;  %3232 = vst [vmem:[#allocation41_spill] sm:$0xff] %v2723_v62  ;;  %vm177_vm12 = vcmp.eq.s32.totalorder %v2729_v60, %v2353_v8  ;;  %v2143_v8 = vld [vmem:[%s3146_s2 + $0x8] ss:$16 sps:$4 sm:$0xff]   ;;  %v1633_v62 = vcombine.high %v53_v63, %v53_v63  ;;  %v1632_v6 = vcombine.low %v53_v63, %v53_v63 }
  0x2c   :  { %3233 = vst [vmem:[#allocation42_spill] sm:$0xff] %v2726_v61  ;;  %3234 = vst [vmem:[#allocation43_spill] sm:$0xff] %v2729_v60  ;;  %1869 = vmatpush3.bf16.msk.msra.mxu0 %vm1646_vm2, %v2240_v20  ;;  %v2140_v61 = vld [vmem:[%s3146_s2] ss:$16 sps:$4 sm:$0xff]   ;;  %v1631_v60 = vcombine.high %v52_v0, %v52_v0  ;;  %s2777_s2 = smov 0  }
  0x2d   :  { %vm1678_vm4 = vmpackc.low %vm175_vm0, %vm174_vm15 }
  0x2e   :  { %1897 = vmatpush3.bf16.msk.msra.mxu1 %vm1678_vm4, %v2240_v20  ;;  %vm1664_vm9 = vmpackc.low %vm161_vm5, %vm160_vm3 }
  0x2f   :  { %1870 = vmatprep.subr.msk.bf16.mxu0 %vm1664_vm9, %v2240_v20  ;;  %vm1696_vm13 = vmpackc.low %vm193_vm7, %vm192_vm6 }
  0x30   :  { %1898 = vmatprep.subr.msk.bf16.mxu1 %vm1696_vm13, %v2240_v20  ;;  %vm1648_vm14 = vmpackc.low %vm145_vm10, %vm144_vm8 }
  0x31   :  { %1871 = vmatpush3.bf16.msk.msra.mxu0 %vm1648_vm14, %v2240_v20  ;;  %vm1680_vm15 = vmpackc.low %vm177_vm12, %vm176_vm11 }
  0x32   :  { %1899 = vmatpush3.bf16.msk.msra.mxu1 %vm1680_vm15, %v2240_v20 }
  0x34   :  { %421 = vmatmul.mubr.bf16.vlgmr.msra.gmra.mrb[0].mxu0 %v2140_v61 }
  0x35   :  { %469 = vmatmul.mubr.bf16.vlgmr.msra.gmra.mrb[0].mxu1 %v2143_v8  ;;  %428 = vmatprep.mubr.bf16.mxu0 %v1631_v60 }
  0x36   :  { %476 = vmatprep.mubr.bf16.mxu1 %v1633_v62 }
  0x3c   :  { %429 = vmatmul.mubr.bf16.gmra.mrb[4].mxu0 %v1630_v3 }
  0x3d   :  { %477 = vmatmul.mubr.bf16.gmra.mrb[4].mxu1 %v1632_v6 }
 0x107   :  { %v1872_v7 = vpop.f32.mrb[0].mxu0 }
 0x108   :  { %v1900_v18 = vpop.f32.mrb[0].mxu1  ;;  %v1873_v10 = vpop.f32.mrb[1].mxu0 }
 0x109   :  { %v1874_v59 = vadd.f32 %v1873_v10, %v1872_v7  ;;  %v1901_v58 = vpop.f32.mrb[1].mxu1  ;;  %v1875_v57 = vpop.f32.mrb[2].mxu0 }
 0x10a   :  { %v1902_v56 = vadd.f32 %v1901_v58, %v1900_v18  ;;  %v1903_v55 = vpop.f32.mrb[2].mxu1  ;;  %v1876_v54 = vpop.f32.mrb[3].mxu0  ;;  %v2771_v18 = vmov 0.0  }
 0x10b   :  { %v1877_v53 = vadd.f32 %v1876_v54, %v1875_v57  ;;  %v1904_v20 = vpop.f32.mrb[3].mxu1  ;;  %v2773_v54 = vmov 0.0  }
 0x10c   :  { %v471_v52 = vadd.f32 %v1902_v56, %v1874_v59  ;;  %v1905_v61 = vadd.f32 %v1904_v20, %v1903_v55  ;;  %v2775_v55 = vmov -1e+30  }
 0x10e   :  { %v474_v8 = vadd.f32 %v1905_v61, %v1877_v53 }
 0x10f   :  { %v1878_v60 = vpop.f32.mrb[4].mxu0 }
 0x110   :  { %v484_v62 = vadd.f32 %v474_v8, %v471_v52  ;;  %v1906_v0 = vpop.f32.mrb[4].mxu1  ;;  %v1879_v63 = vpop.f32.mrb[5].mxu0 }
 0x111   :  { %v1880_v3 = vadd.f32 %v1879_v63, %v1878_v60  ;;  %v1907_v6 = vpop.f32.mrb[5].mxu1  ;;  %v1881_v51 = vpop.f32.mrb[6].mxu0 }
 0x112   :  { %v1908_v50 = vadd.f32 %v1907_v6, %v1906_v0  ;;  %v1909_v49 = vpop.f32.mrb[6].mxu1  ;;  %v1882_v7 = vpop.f32.mrb[7].mxu0 }
 0x113   :  { %v1910_v10 = vpop.f32.mrb[7].mxu1 }
 0x114   :  { %v479_v48 = vadd.f32 %v1908_v50, %v1880_v3 }
 0x116   :  { %v2769_v58 = vadd.f32 %v484_v62, %v479_v48 }
 0x117 LB: > { %v3235_v9 = vld [vmem:[#allocation12_spill] sm:$0xff]  ;;  %v3236_v5 = vld [vmem:[#allocation9_spill] sm:$0xff]  ;;  %v3238_v2 = vld [vmem:[#allocation7_spill] sm:$0xff]  ;;  %s495_s17 = scalar_lea.vmem %s3145_s1, %s2238_s2  ;;  %v2241_v53 = vmov 1.0|1.0   ;;  %s491_s2 = sadd.s32 1, %s2238_s2   ;;  %v2226_v18 = vphi %v2771_v18, %v3273_v18   ;;  %s2238_s2 = sphi %s2777_s2, %s491_s2   ;;  %v2234_v55 = vphi %v2775_v55, %v3275_v55   ;;  %v2230_v54 = vphi %v2773_v54, %v3274_v54  }
 0x118   : > { %v3237_v4 = vld [vmem:[#allocation8_spill] sm:$0xff]  ;;  %v3239_v1 = vld [vmem:[#allocation6_spill] sm:$0xff]  ;;  %v2792_v48 = vsub.s32 0, %v3235_v9  ;;  %v1765_v50 = vcombine.high %v3238_v2, %v3236_v5  ;;  %v2802_v51 = vld [vmem:[%s495_s17] sm:$0x1]  ;;  %p488_p0 = scmp.ge.s32.totalorder %s491_s2, 8  }
 0x119   : > { %v1763_v49 = vcombine.high %v3239_v1, %v3237_v4  ;;  %v3240_v11 = vld [vmem:[#allocation13_spill] sm:$0xff]  ;;  %v3241_v12 = vld [vmem:[#allocation14_spill] sm:$0xff]  ;;  %v3242_v13 = vld [vmem:[#allocation15_spill] sm:$0xff]  ;;  %s2246_s29 = smov (%p488_p0), [#allocation3]  }
 0x11a   : > { %839 = vmatprep.mubr.bf16.mxu1 %v1765_v50  ;;  %v2806_v52 = vrot.slane %v2802_v51, %v2792_v48  ;;  %v3243_v56 = vld [vmem:[#allocation16_spill] sm:$0xff]  ;;  %v3244_v57 = vld [vmem:[#allocation17_spill] sm:$0xff]  ;;  %v3245_v59 = vld [vmem:[#allocation18_spill] sm:$0xff] }
 0x11b   : > { %791 = vmatprep.mubr.bf16.mxu0 %v1763_v49  ;;  %v3246_v20 = vld [vmem:[#allocation19_spill] sm:$0xff]  ;;  %v3247_v61 = vld [vmem:[#allocation20_spill] sm:$0xff]  ;;  %v3248_v8 = vld [vmem:[#allocation21_spill] sm:$0xff] }
 0x11c   : > { %vm517_vm0 = vcmp.eq.s32.totalorder %v3240_v11, %v2806_v52  ;;  %vm518_vm1 = vcmp.eq.s32.totalorder %v3241_v12, %v2806_v52  ;;  %vm549_vm2 = vcmp.eq.s32.totalorder %v3242_v13, %v2806_v52  ;;  %vm550_vm3 = vcmp.eq.s32.totalorder %v2370_v14, %v2806_v52  ;;  %v3249_v60 = vld [vmem:[#allocation22_spill] sm:$0xff]  ;;  %v3250_v62 = vld [vmem:[#allocation23_spill] sm:$0xff]  ;;  %v3251_v0 = vld [vmem:[#allocation24_spill] sm:$0xff] }
 0x11d   : > { %vm1786_vm4 = vmpackc.low %vm518_vm1, %vm517_vm0  ;;  %vm501_vm5 = vcmp.eq.s32.totalorder %v3235_v9, %v2806_v52  ;;  %vm502_vm6 = vcmp.eq.s32.totalorder %v2373_v15, %v2806_v52  ;;  %vm533_vm7 = vcmp.eq.s32.totalorder %v2378_v16, %v2806_v52  ;;  %vm534_vm8 = vcmp.eq.s32.totalorder %v2381_v17, %v2806_v52  ;;  %v3252_v63 = vld [vmem:[#allocation25_spill] sm:$0xff]  ;;  %v3253_v3 = vld [vmem:[#allocation26_spill] sm:$0xff] }
 0x11e   : > { %1912 = vmatprep.subr.msk.bf16.mxu0 %vm1786_vm4, %v2241_v53  ;;  %vm1818_vm9 = vmpackc.low %vm550_vm3, %vm549_vm2  ;;  %vm519_vm10 = vcmp.eq.s32.totalorder %v2401_v19, %v2806_v52  ;;  %vm520_vm11 = vcmp.eq.s32.totalorder %v2405_v21, %v2806_v52  ;;  %vm551_vm13 = vcmp.eq.s32.totalorder %v2408_v22, %v2806_v52  ;;  %vm552_vm14 = vcmp.eq.s32.totalorder %v2411_v23, %v2806_v52  ;;  %v3254_v6 = vld [vmem:[#allocation27_spill] sm:$0xff]  ;;  %v3255_v7 = vld [vmem:[#allocation28_spill] sm:$0xff] }
 0x11f   : > { %1940 = vmatprep.subr.msk.bf16.mxu1 %vm1818_vm9, %v2241_v53  ;;  %vm1770_vm12 = vmpackc.low %vm502_vm6, %vm501_vm5  ;;  %vm503_vm0 = vcmp.eq.s32.totalorder %v2414_v24, %v2806_v52  ;;  %vm504_vm1 = vcmp.eq.s32.totalorder %v2423_v25, %v2806_v52  ;;  %vm535_vm3 = vcmp.eq.s32.totalorder %v2426_v26, %v2806_v52  ;;  %vm536_vm4 = vcmp.eq.s32.totalorder %v2429_v27, %v2806_v52  ;;  %v3256_v10 = vld [vmem:[#allocation29_spill] sm:$0xff]  ;;  %v3257_v49 = vld [vmem:[#allocation30_spill] sm:$0xff] }
 0x120   : > { %1913 = vmatpush3.bf16.msk.msra.mxu0 %vm1770_vm12, %v2241_v53  ;;  %vm1802_vm15 = vmpackc.low %vm534_vm8, %vm533_vm7  ;;  %vm521_vm6 = vcmp.eq.s32.totalorder %v2454_v28, %v2806_v52  ;;  %vm522_vm7 = vcmp.eq.s32.totalorder %v2458_v29, %v2806_v52  ;;  %vm553_vm9 = vcmp.eq.s32.totalorder %v2461_v30, %v2806_v52  ;;  %vm505_vm12 = vcmp.eq.s32.totalorder %v2467_v32, %v2806_v52  ;;  %v3258_v50 = vld [vmem:[#allocation31_spill] sm:$0xff]  ;;  %v1251_v14 = vld [vmem:[%s3152_s8] sm:$0xff] (%p488_p0) }
 0x121   : > { %1941 = vmatpush3.bf16.msk.msra.mxu1 %vm1802_vm15, %v2241_v53  ;;  %vm1788_vm2 = vmpackc.low %vm520_vm11, %vm519_vm10  ;;  %vm554_vm10 = vcmp.eq.s32.totalorder %v2464_v31, %v2806_v52  ;;  %vm537_vm15 = vcmp.eq.s32.totalorder %v2476_v34, %v2806_v52  ;;  %v1254_v15 = vld [vmem:[%s3152_s8 + $0x18] sm:$0xff] (%p488_p0)  ;;  %v1256_v17 = vld [vmem:[%s3152_s8 + $0x28] sm:$0xff] (%p488_p0) }
 0x122   : > { %1914 = vmatprep.subr.msk.bf16.mxu0 %vm1788_vm2, %v2241_v53  ;;  %vm1820_vm5 = vmpackc.low %vm552_vm14, %vm551_vm13  ;;  %vm506_vm13 = vcmp.eq.s32.totalorder %v2473_v33, %v2806_v52  ;;  %vm523_vm2 = vcmp.eq.s32.totalorder %v2504_v36, %v2806_v52  ;;  %v895_v21 = vld [vmem:[%s3148_s4] sm:$0xff] (%p488_p0)  ;;  %v1258_v22 = vld [vmem:[%s3152_s8 + $0x38] sm:$0xff] (%p488_p0)  ;;  %s1538_s4 = sshll.u32 (%p488_p0), %s2246_s29, 4  ;;  %s1539_s4 = int_to_ptr.vmem [resolvable:$true] %s1538_s4 }
 0x123   : > { %1942 = vmatprep.subr.msk.bf16.mxu1 %vm1820_vm5, %v2241_v53  ;;  %vm1772_vm8 = vmpackc.low %vm504_vm1, %vm503_vm0  ;;  %vm538_vm0 = vcmp.eq.s32.totalorder %v2479_v35, %v2806_v52  ;;  %vm555_vm5 = vcmp.eq.s32.totalorder %v2511_v38, %v2806_v52  ;;  %v1320_v23 = vld [vmem:[%s3154_s10 + $0x8] sm:$0xff] (%p488_p0)  ;;  %v1322_v24 = vld [vmem:[%s3154_s10 + $0x18] sm:$0xff] (%p488_p0)  ;;  %s2184_s30 = scalar_lea.vmem (%p488_p0), %s1539_s4, 16  ;;  %s2188_s14 = scalar_lea.vmem (%p488_p0), %s1539_s4, 32 }
 0x124   : > { %1915 = vmatpush3.bf16.msk.msra.mxu0 %vm1772_vm8, %v2241_v53  ;;  %vm1804_vm11 = vmpackc.low %vm536_vm4, %vm535_vm3  ;;  %vm524_vm3 = vcmp.eq.s32.totalorder %v2508_v37, %v2806_v52  ;;  %vm507_vm8 = vcmp.eq.s32.totalorder %v2517_v40, %v2806_v52  ;;  %v985_v25 = vld [vmem:[%s3151_s7] sm:$0xff] (%p488_p0)  ;;  %v1252_v26 = vld [vmem:[%s3152_s8 + $0x8] sm:$0xff] (%p488_p0)  ;;  %p2185_p1 = scmp.ne.s32.totalorder (%p488_p0), %s1539_s4, %s2184_s30  ;;  %p2189_p2 = scmp.lt.s32.totalorder (%p488_p0), %s1539_s4, %s1539_s4 }
 0x125   : > { %1943 = vmatpush3.bf16.msk.msra.mxu1 %vm1804_vm11, %v2241_v53  ;;  %vm1790_vm14 = vmpackc.low %vm522_vm7, %vm521_vm6  ;;  %vm556_vm6 = vcmp.eq.s32.totalorder %v2514_v39, %v2806_v52  ;;  %vm539_vm11 = vcmp.eq.s32.totalorder %v2526_v42, %v2806_v52  ;;  %v1253_v27 = vld [vmem:[%s3152_s8 + $0x10] sm:$0xff] (%p488_p0)  ;;  %v1255_v28 = vld [vmem:[%s3152_s8 + $0x20] sm:$0xff] (%p488_p0)  ;;  %p2190_p3 = scmp.lt.s32.totalorder (%p488_p0), %s2188_s14, %s2184_s30 }
 0x126   : > { %1916 = vmatprep.subr.msk.bf16.mxu0 %vm1790_vm14, %v2241_v53  ;;  %vm1822_vm1 = vmpackc.low %vm554_vm10, %vm553_vm9  ;;  %vm508_vm9 = vcmp.eq.s32.totalorder %v2523_v41, %v2806_v52  ;;  %vm525_vm14 = vcmp.eq.s32.totalorder %v2554_v44, %v2806_v52  ;;  %v1257_v29 = vld [vmem:[%s3152_s8 + $0x30] sm:$0xff] (%p488_p0)  ;;  %v1319_v30 = vld [vmem:[%s3154_s10] sm:$0xff] (%p488_p0) }
 0x127   : > { %1944 = vmatprep.subr.msk.bf16.mxu1 %vm1822_vm1, %v2241_v53  ;;  %vm1774_vm4 = vmpackc.low %vm506_vm13, %vm505_vm12  ;;  %vm540_vm12 = vcmp.eq.s32.totalorder %v2529_v43, %v2806_v52  ;;  %vm557_vm1 = vcmp.eq.s32.totalorder %v2561_v46, %v2806_v52  ;;  %v1321_v31 = vld [vmem:[%s3154_s10 + $0x10] sm:$0xff] (%p488_p0)  ;;  %v1446_v32 = vld [vmem:[#allocation2] sm:$0x1] (%p488_p0)  ;;  %p2191_p4 = por (%p488_p0), %p2190_p3, %p2189_p2 }
 0x128   : > { %1917 = vmatpush3.bf16.msk.msra.mxu0 %vm1774_vm4, %v2241_v53  ;;  %vm1806_vm7 = vmpackc.low %vm538_vm0, %vm537_vm15  ;;  %vm526_vm15 = vcmp.eq.s32.totalorder %v2558_v45, %v2806_v52  ;;  %vm509_vm4 = vcmp.eq.s32.totalorder %v3243_v56, %v2806_v52  ;;  %v3259_v56 = vld [vmem:[#allocation32_spill] sm:$0xff]  ;;  %v986_v38 = vld [vmem:[%s3151_s7 + $0x8] sm:$0xff] (%p488_p0) }
 0x129   : > { %1945 = vmatpush3.bf16.msk.msra.mxu1 %vm1806_vm7, %v2241_v53  ;;  %vm1792_vm10 = vmpackc.low %vm524_vm3, %vm523_vm2  ;;  %vm558_vm2 = vcmp.eq.s32.totalorder %v2564_v47, %v2806_v52  ;;  %vm541_vm7 = vcmp.eq.s32.totalorder %v3245_v59, %v2806_v52  ;;  %v3261_v59 = vld [vmem:[#allocation34_spill] sm:$0xff]  ;;  %v987_v39 = vld [vmem:[%s3151_s7 + $0x10] sm:$0xff] (%p488_p0)  ;;  %p2192_p5 = pnand (%p488_p0), %p2191_p4, %p2185_p1 }
 0x12a   : > { %1918 = vmatprep.subr.msk.bf16.mxu0 %vm1792_vm10, %v2241_v53  ;;  %vm1824_vm13 = vmpackc.low %vm556_vm6, %vm555_vm5  ;;  %vm510_vm5 = vcmp.eq.s32.totalorder %v3244_v57, %v2806_v52  ;;  %vm527_vm10 = vcmp.eq.s32.totalorder %v3247_v61, %v2806_v52  ;;  %v3260_v57 = vld [vmem:[#allocation33_spill] sm:$0xff]  ;;  %v3263_v61 = vld [vmem:[#allocation36_spill] sm:$0xff] }
 0x12b   : > { %1946 = vmatprep.subr.msk.bf16.mxu1 %vm1824_vm13, %v2241_v53  ;;  %vm1776_vm0 = vmpackc.low %vm508_vm9, %vm507_vm8  ;;  %vm542_vm8 = vcmp.eq.s32.totalorder %v3246_v20, %v2806_v52  ;;  %vm559_vm13 = vcmp.eq.s32.totalorder %v3249_v60, %v2806_v52  ;;  %v3262_v20 = vld [vmem:[#allocation35_spill] sm:$0xff]  ;;  %v3265_v60 = vld [vmem:[#allocation38_spill] sm:$0xff] }
 0x12c   : > { %1919 = vmatpush3.bf16.msk.msra.mxu0 %vm1776_vm0, %v2241_v53  ;;  %vm1808_vm3 = vmpackc.low %vm540_vm12, %vm539_vm11  ;;  %vm528_vm11 = vcmp.eq.s32.totalorder %v3248_v8, %v2806_v52  ;;  %vm511_vm0 = vcmp.eq.s32.totalorder %v3251_v0, %v2806_v52  ;;  %v3264_v8 = vld [vmem:[#allocation37_spill] sm:$0xff]  ;;  %v3267_v0 = vld [vmem:[#allocation40_spill] sm:$0xff] }
 0x12d   : > { %1947 = vmatpush3.bf16.msk.msra.mxu1 %vm1808_vm3, %v2241_v53  ;;  %vm1794_vm6 = vmpackc.low %vm526_vm15, %vm525_vm14  ;;  %vm560_vm14 = vcmp.eq.s32.totalorder %v3250_v62, %v2806_v52  ;;  %vm543_vm3 = vcmp.eq.s32.totalorder %v3253_v3, %v2806_v52  ;;  %v3266_v62 = vld [vmem:[#allocation39_spill] sm:$0xff]  ;;  %v3269_v3 = vld [vmem:[#allocation42_spill] sm:$0xff] }
 0x12e   : > { %1920 = vmatprep.subr.msk.bf16.mxu0 %vm1794_vm6, %v2241_v53  ;;  %vm1826_vm9 = vmpackc.low %vm558_vm2, %vm557_vm1  ;;  %vm512_vm1 = vcmp.eq.s32.totalorder %v3252_v63, %v2806_v52  ;;  %vm529_vm6 = vcmp.eq.s32.totalorder %v3255_v7, %v2806_v52  ;;  %v3268_v63 = vld [vmem:[#allocation41_spill] sm:$0xff]  ;;  %v1762_v7 = vcombine.low %v3239_v1, %v3237_v4  ;;  %v990_v42 = vld [vmem:[%s3151_s7 + $0x28] sm:$0xff] (%p488_p0) }
 0x12f   : > { %1948 = vmatprep.subr.msk.bf16.mxu1 %vm1826_vm9, %v2241_v53  ;;  %vm1778_vm12 = vmpackc.low %vm510_vm5, %vm509_vm4  ;;  %vm544_vm4 = vcmp.eq.s32.totalorder %v3254_v6, %v2806_v52  ;;  %vm561_vm9 = vcmp.eq.s32.totalorder %v3257_v49, %v2806_v52  ;;  %v3270_v6 = vld [vmem:[#allocation43_spill] sm:$0xff]  ;;  %v3271_v49 = vld [vmem:[#allocation10_spill] sm:$0xff] }
 0x130   : > { %1921 = vmatpush3.bf16.msk.msra.mxu0 %vm1778_vm12, %v2241_v53  ;;  %vm1810_vm15 = vmpackc.low %vm542_vm8, %vm541_vm7  ;;  %vm530_vm7 = vcmp.eq.s32.totalorder %v3256_v10, %v2806_v52  ;;  %vm513_vm12 = vcmp.eq.s32.totalorder %v3259_v56, %v2806_v52  ;;  %v1764_v10 = vcombine.low %v3238_v2, %v3236_v5  ;;  %v988_v40 = vld [vmem:[%s3151_s7 + $0x18] sm:$0xff] (%p488_p0)  ;;  %v989_v41 = vld [vmem:[%s3151_s7 + $0x20] sm:$0xff] (%p488_p0) }
 0x131   : > { %1949 = vmatpush3.bf16.msk.msra.mxu1 %vm1810_vm15, %v2241_v53  ;;  %vm1796_vm2 = vmpackc.low %vm528_vm11, %vm527_vm10  ;;  %vm562_vm10 = vcmp.eq.s32.totalorder %v3258_v50, %v2806_v52  ;;  %vm545_vm15 = vcmp.eq.s32.totalorder %v3261_v59, %v2806_v52  ;;  %v1767_v50 = vcombine.high %v3271_v49, %v3271_v49  ;;  %v991_v43 = vld [vmem:[%s3151_s7 + $0x30] sm:$0xff] (%p488_p0)  ;;  %v992_v44 = vld [vmem:[%s3151_s7 + $0x38] sm:$0xff] (%p488_p0) }
 0x132   : > { %1922 = vmatprep.subr.msk.bf16.mxu0 %vm1796_vm2, %v2241_v53  ;;  %vm1828_vm5 = vmpackc.low %vm560_vm14, %vm559_vm13  ;;  %vm514_vm13 = vcmp.eq.s32.totalorder %v3260_v57, %v2806_v52  ;;  %vm531_vm2 = vcmp.eq.s32.totalorder %v3263_v61, %v2806_v52  ;;  %v1766_v57 = vcombine.low %v3271_v49, %v3271_v49  ;;  %v977_v45 = vld [vmem:[%s3150_s6] sm:$0xff] (%p488_p0)  ;;  %v978_v46 = vld [vmem:[%s3150_s6 + $0x8] sm:$0xff] (%p488_p0) }
 0x133   : > { %1950 = vmatprep.subr.msk.bf16.mxu1 %vm1828_vm5, %v2241_v53  ;;  %vm1780_vm8 = vmpackc.low %vm512_vm1, %vm511_vm0  ;;  %vm546_vm0 = vcmp.eq.s32.totalorder %v3262_v20, %v2806_v52  ;;  %vm563_vm5 = vcmp.eq.s32.totalorder %v3265_v60, %v2806_v52  ;;  %v979_v47 = vld [vmem:[%s3150_s6 + $0x10] sm:$0xff] (%p488_p0) }
 0x134   : > { %1923 = vmatpush3.bf16.msk.msra.mxu0 %vm1780_vm8, %v2241_v53  ;;  %vm1812_vm11 = vmpackc.low %vm544_vm4, %vm543_vm3  ;;  %vm532_vm3 = vcmp.eq.s32.totalorder %v3264_v8, %v2806_v52  ;;  %vm515_vm8 = vcmp.eq.s32.totalorder %v3267_v0, %v2806_v52  ;;  %v983_v49 = vld [vmem:[%s3150_s6 + $0x30] sm:$0xff] (%p488_p0) }
 0x135   : > { %1951 = vmatpush3.bf16.msk.msra.mxu1 %vm1812_vm11, %v2241_v53  ;;  %vm1798_vm14 = vmpackc.low %vm530_vm7, %vm529_vm6  ;;  %vm564_vm6 = vcmp.eq.s32.totalorder %v3266_v62, %v2806_v52  ;;  %vm547_vm11 = vcmp.eq.s32.totalorder %v3269_v3, %v2806_v52 }
 0x136   : > { %1924 = vmatprep.subr.msk.bf16.mxu0 %vm1798_vm14, %v2241_v53  ;;  %vm1830_vm1 = vmpackc.low %vm562_vm10, %vm561_vm9  ;;  %vm516_vm9 = vcmp.eq.s32.totalorder %v3268_v63, %v2806_v52 }
 0x137   : > { %1952 = vmatprep.subr.msk.bf16.mxu1 %vm1830_vm1, %v2241_v53  ;;  %vm1782_vm4 = vmpackc.low %vm514_vm13, %vm513_vm12  ;;  %vm548_vm12 = vcmp.eq.s32.totalorder %v3270_v6, %v2806_v52  ;;  %v3272_v52 = vld [vmem:[#allocation11_spill] sm:$0xff]  ;;  %vm867_vm1 = vcmp.ne.s32.totalorder %v2802_v51, 0 }
 0x138   : > { %1925 = vmatpush3.bf16.msk.msra.mxu0 %vm1782_vm4, %v2241_v53  ;;  %vm1814_vm7 = vmpackc.low %vm546_vm0, %vm545_vm15  ;;  %v1769_v56 = vcombine.high %v3272_v52, %v3272_v52  ;;  %v1768_v59 = vcombine.low %v3272_v52, %v3272_v52  ;;  %vm858_vm0 = vcmask 15360   ;;  %v984_v52 = vld [vmem:[%s3150_s6 + $0x38] sm:$0xff] (%p488_p0)  ;;  %vm1343_vm4 = vcmask (%p488_p0), 523264  }
 0x139   : > { %1953 = vmatpush3.bf16.msk.msra.mxu1 %vm1814_vm7, %v2241_v53  ;;  %vm1800_vm10 = vmpackc.low %vm532_vm3, %vm531_vm2  ;;  %vm2243_vm2 = vmmov (%p488_p0), 0   ;;  %vm902_vm3 = vcmask (%p488_p0), 64512  }
 0x13a   : > { %1926 = vmatprep.subr.msk.bf16.mxu0 %vm1800_vm10, %v2241_v53  ;;  %vm1832_vm13 = vmpackc.low %vm564_vm6, %vm563_vm5  ;;  %vm1456_vm5 = vcmask (%p488_p0), 261120   ;;  %vm1530_vm6 = vcmask (%p488_p0), 8192  }
 0x13b   : > { %1954 = vmatprep.subr.msk.bf16.mxu1 %vm1832_vm13, %v2241_v53  ;;  %vm1784_vm14 = vmpackc.low %vm516_vm9, %vm515_vm8 }
 0x13c   : > { %1927 = vmatpush3.bf16.msk.msra.mxu0 %vm1784_vm14, %v2241_v53  ;;  %vm1816_vm15 = vmpackc.low %vm548_vm12, %vm547_vm11 }
 0x13d   : > { %1955 = vmatpush3.bf16.msk.msra.mxu1 %vm1816_vm15, %v2241_v53 }
 0x13f   : > { %792 = vmatmul.mubr.bf16.vlgmr.msra.gmra.mrb[0].mxu0 %v1762_v7 }
 0x140   : > { %840 = vmatmul.mubr.bf16.vlgmr.msra.gmra.mrb[0].mxu1 %v1764_v10  ;;  %799 = vmatprep.mubr.bf16.mxu0 %v1767_v50 }
 0x141   : > { %847 = vmatprep.mubr.bf16.mxu1 %v1769_v56 }
 0x147   : > { %800 = vmatmul.mubr.bf16.gmra.mrb[4].mxu0 %v1766_v57 }
 0x148   : > { %848 = vmatmul.mubr.bf16.gmra.mrb[4].mxu1 %v1768_v59 }
 0x149   :  { %2012 = vmatprep.mubr.msk.f32.mxu1 (%p488_p0), %vm902_vm3, %v985_v25 }
 0x212   : > { %v1928_v20 = vpop.f32.mrb[0].mxu0 }
 0x213   : > { %v1956_v61 = vpop.f32.mrb[0].mxu1  ;;  %v1929_v8 = vpop.f32.mrb[1].mxu0 }
 0x214   : > { %v1930_v60 = vadd.f32 %v1929_v8, %v1928_v20  ;;  %v1957_v53 = vpop.f32.mrb[1].mxu1  ;;  %v1931_v62 = vpop.f32.mrb[2].mxu0 }
 0x215   : > { %v1958_v0 = vadd.f32 %v1957_v53, %v1956_v61  ;;  %v1959_v63 = vpop.f32.mrb[2].mxu1  ;;  %v1932_v3 = vpop.f32.mrb[3].mxu0 }
 0x216   : > { %v1933_v6 = vadd.f32 %v1932_v3, %v1931_v62  ;;  %v1960_v7 = vpop.f32.mrb[3].mxu1 }
 0x217   : > { %v842_v10 = vadd.f32 %v1958_v0, %v1930_v60  ;;  %v1961_v50 = vadd.f32 %v1960_v7, %v1959_v63 }
 0x219   : > { %v845_v56 = vadd.f32 %v1961_v50, %v1933_v6 }
 0x21a   : > { %v1934_v1 = vpop.f32.mrb[4].mxu0 }
 0x21b   : > { %v855_v2 = vadd.f32 %v845_v56, %v842_v10  ;;  %v1962_v4 = vpop.f32.mrb[4].mxu1  ;;  %v1935_v5 = vpop.f32.mrb[5].mxu0 }
 0x21c   : > { %v1936_v57 = vadd.f32 %v1935_v5, %v1934_v1  ;;  %v1963_v59 = vpop.f32.mrb[5].mxu1  ;;  %v1937_v9 = vpop.f32.mrb[6].mxu0 }
 0x21d   : > { %v1964_v11 = vadd.f32 %v1963_v59, %v1962_v4  ;;  %v1965_v12 = vpop.f32.mrb[6].mxu1  ;;  %v1938_v20 = vpop.f32.mrb[7].mxu0 }
 0x21e   : > { %v1966_v8 = vpop.f32.mrb[7].mxu1 }
 0x21f   : > { %v850_v13 = vadd.f32 %v1964_v11, %v1936_v57 }
 0x221   : > { %v856_v61 = vadd.f32 %v855_v2, %v850_v13 }
 0x223   : > { %v857_v53 = vmul.f32 %v856_v61, %v2769_v58 }
 0x225   : > { %v859_v62 = vsel %vm858_vm0, %v857_v53, 0.0  ;;  %v896_v53 = vld [vmem:[%s3149_s5] sm:$0xff] (%p488_p0) }
 0x226   : > { %v860_v60 = vrot.slane %v859_v62, 4 }
 0x228   : > { %v861_v0 = vadd.f32 %v860_v60, %v859_v62  ;;  %v2244_v62 = vmov (%p488_p0), 0   ;;  %v1315_v60 = vld [vmem:[%s3153_s9] sm:$0xff] (%p488_p0) }
 0x229   :  { %2154 = vset.pattern.permute.xlu0 (%p488_p0), %v2244_v62  ;;  %2155 = vset.pattern.permute.xlu1 (%p488_p0), %v2244_v62 }
 0x22a   : > { %v862_v63 = vrot.slane %v861_v0, 2  ;;  %899 = vperm.xlu0 (%p488_p0), %2154, %v896_v53   ;;  %1266 = vperm.xlu1 (%p488_p0), %2155, %v1252_v26  }
 0x22c   : > { %v863_v3 = vadd.f32 %v862_v63, %v861_v0 }
 0x22e   : > { %v864_v6 = vrot.slane %v863_v3, 1  ;;  %1261 = vperm.xlu0 (%p488_p0), %2154, %v1251_v14   ;;  %1271 = vperm.xlu1 (%p488_p0), %2155, %v1253_v27  }
 0x230   : > { %v865_v7 = vadd.f32 %v864_v6, %v863_v3 }
 0x232   : > { %v866_v1 = vmul.f32 0.35355338, %v865_v7  ;;  %1276 = vperm.xlu0 (%p488_p0), %2154, %v1254_v15   ;;  %1281 = vperm.xlu1 (%p488_p0), %2155, %v1255_v28   ;;  %v1316_v28 = vld [vmem:[%s3153_s9 + $0x8] sm:$0xff] (%p488_p0) }
 0x234   : > { %v868_v5 = vsel %vm867_vm1, %v866_v1, -1e+09 }
 0x235   : > { %v869_v4 = vmax.f32 %v2234_v55, %v868_v5  }
 0x236   :  { %1286 = vperm.xlu0 (%p488_p0), %2154, %v1256_v17   ;;  %1291 = vperm.xlu1 (%p488_p0), %2155, %v1257_v29   ;;  %v1317_v29 = vld [vmem:[%s3153_s9 + $0x10] sm:$0xff] (%p488_p0) }
 0x237   : > { %v870_v9 = vsub.f32 %v2234_v55, %v869_v4  ;;  %v873_v11 = vsub.f32 %v868_v5, %v869_v4  ;;  %v3275_v55 = vmov %v869_v4 }
 0x239   : > { %v871_v2 = vmul.f32 1.442695, %v870_v9  ;;  %v874_v12 = vmul.f32 1.442695, %v873_v11 }
 0x23a   :  { %1296 = vperm.xlu0 (%p488_p0), %2154, %v1258_v22   ;;  %1325 = vperm.xlu1 (%p488_p0), %2155, %v1319_v30   ;;  %v1318_v30 = vld [vmem:[%s3153_s9 + $0x18] sm:$0xff] (%p488_p0) }
 0x23b   : > { %2150 = vpow2.f32 %v871_v2 }
 0x23c   : > { %2152 = vpow2.f32 %v874_v12 }
 0x23e   :  { %1330 = vperm.xlu0 (%p488_p0), %2154, %v1320_v23   ;;  %1335 = vperm.xlu1 (%p488_p0), %2155, %v1321_v31   ;;  %v2245_v31 = vmov (%p488_p0), 0.0|0.0  }
 0x242   :  { %1340 = vperm.xlu0 (%p488_p0), %2154, %v1322_v24   ;;  %1449 = vperm.xlu1 (%p488_p0), %2155, %v1446_v32  }
 0x245   : > { %v2151_v13 = vpop.eup %2150 }
 0x246   : > { %v2153_v10 = vpop.eup %2152  ;;  %v876_v50 = vmul.f32 %v2230_v54, %v2151_v13  ;;  %v881_v56 = vrot.slane %v2151_v13, %v2792_v48 }
 0x247   : > { %v886_v57 = vrot.slane %v2153_v10, %v2792_v48  ;;  %490 = sbr.rel (!%p488_p0) target bundleno = 279 (0x117), region = 80 }
 0x248   : > { %v877_v51 = vadd.f32 %v2153_v10, %v876_v50   ;;  %v882_v59 = vmul.f32 %v2226_v18, %v881_v56 }
 0x249   : > { %v887_v20 = vmul.f32 %v886_v57, %v856_v61  ;;  %v2242_v61 = vmov (%p488_p0), 0.0  }
 0x24a   : > { %v3274_v54 = vmov %v877_v51  ;;  %v892_v55 = vrot.slane (%p488_p0), %v877_v51, %v2792_v48  ;;  %2005 = vmatprep.subr.mxu0 (%p488_p0), %v2242_v61  ;;  %2007 = vmatprep.mubr.msk.f32.mxu0 (%p488_p0), %vm2243_vm2, %v2242_v61 }
 0x24b   : > { %v888_v8 = vadd.f32 %v887_v20, %v882_v59   ;;  %v982_v54 = vld [vmem:[%s3150_s6 + $0x28] sm:$0xff] (%p488_p0) }
 0x24c   :  { %2156 = vrcp.f32 (%p488_p0), %v892_v55 }
 0x24d   : > { %v3273_v18 = vmov %v888_v8 }
 0x24e   :  { %v981_v18 = vld [vmem:[%s3150_s6 + $0x20] sm:$0xff] }
 0x256   :  { %v2157_v16 = vpop.eup %2156 }
 0x257   :  { %v894_v19 = vmul.f32 %v2157_v16, %v888_v8 }
 0x259   :  { %2006 = vmatpush3.msra.mxu0 %v894_v19 }
 0x25a   :  { %2008 = vmatmul.mubr.msk.f32.vlgmr.msra.gmra.mrb[0].mxu0 %vm902_vm3, %v895_v21 }
 0x25b   :  { %2054 = vmatprep.mubr.msk.f32.mxu0 %vm1343_vm4, %v1315_v60 }
 0x2a9   :  { %v900_v33 = vpop.permute.xlu0 %899  ;;  %v1267_v63 = vpop.permute.xlu1 %1266 }
 0x2ad   :  { %v1262_v0 = vpop.permute.xlu0 %1261  ;;  %v1272_v7 = vpop.permute.xlu1 %1271 }
 0x2b1   :  { %v1277_v3 = vpop.permute.xlu0 %1276  ;;  %v1282_v10 = vpop.permute.xlu1 %1281 }
 0x2b5   :  { %v1287_v12 = vpop.permute.xlu0 %1286  ;;  %v1292_v55 = vpop.permute.xlu1 %1291 }
 0x2b9   :  { %v1297_v59 = vpop.permute.xlu0 %1296 }
 0x2bd   :  { %v1331_v32 = vpop.permute.xlu0 %1330 }
 0x32d   :  { %v972_v34 = vpop.f32.mrb[0].mxu0 }
 0x32e   :  { %v973_v35 = vadd.f32 %v972_v34, %v900_v33  ;;  %v2009_v36 = vpop.f32.mrb[1].mxu0  ;;  %v1326_v33 = vpop.permute.xlu1 %1325 }
 0x330   :  { %2158 = vtanh.f32 %v973_v35 }
 0x33a   :  { %v2159_v37 = vpop.eup %2158 }
 0x33b   :  { %2010 = vmatprep.subr.mxu1 %v2159_v37 }
 0x33c   :  { %2011 = vmatpush3.msra.mxu1 %v2159_v37 }
 0x33d   :  { %2013 = vmatmul.mubr.msk.f32.vlgmr.msra.gmra.mrb[0].mxu1 %vm902_vm3, %v986_v38  ;;  %2024 = vmatprep.subr.mxu1 %v2769_v58  ;;  %v1341_v38 = vpop.permute.xlu0 %1340 }
 0x33e   :  { %2025 = vmatpush3.msra.mxu1 %v2769_v58  ;;  %2015 = vmatprep.mubr.msk.f32.mxu1 %vm902_vm3, %v987_v39  ;;  %v980_v58 = vld [vmem:[%s3150_s6 + $0x18] sm:$0xff] }
 0x341   :  { %2016 = vmatmul.mubr.msk.f32.gmra.mrb[2].mxu1 %vm902_vm3, %v988_v40  ;;  %v1336_v40 = vpop.permute.xlu1 %1335 }
 0x342   :  { %2018 = vmatprep.mubr.msk.f32.mxu1 %vm902_vm3, %v989_v41 }
 0x345   :  { %2019 = vmatmul.mubr.msk.f32.gmra.mrb[4].mxu1 %vm902_vm3, %v990_v42 }
 0x346   :  { %2021 = vmatprep.mubr.msk.f32.mxu1 %vm902_vm3, %v991_v43 }
 0x349   :  { %2022 = vmatmul.mubr.msk.f32.gmra.mrb[6].mxu1 %vm902_vm3, %v992_v44 }
 0x34a   :  { %2026 = vmatprep.mubr.msk.f32.mxu1 %vm902_vm3, %v977_v45 }
 0x34d   :  { %2027 = vmatmul.mubr.msk.f32.vlgmr.msra.gmra.mrb[0].mxu1 %vm902_vm3, %v978_v46 }
 0x34e   :  { %2029 = vmatprep.mubr.msk.f32.mxu1 %vm902_vm3, %v979_v47 }
 0x351   :  { %2030 = vmatmul.mubr.msk.f32.gmra.mrb[2].mxu1 %vm902_vm3, %v980_v58 }
 0x352   :  { %2032 = vmatprep.mubr.msk.f32.mxu1 %vm902_vm3, %v981_v18  ;;  %v1445_v18 = vld [vmem:[%s3155_s11] sm:$0x1] }
 0x355   :  { %2033 = vmatmul.mubr.msk.f32.gmra.mrb[4].mxu1 %vm902_vm3, %v982_v54  ;;  %v1450_v54 = vpop.permute.xlu1 %1449 }
 0x356   :  { %2035 = vmatprep.mubr.msk.f32.mxu1 %vm902_vm3, %v983_v49  ;;  %v1455_v49 = vrot.slane %v1450_v54, %v2792_v48 }
 0x359   :  { %2036 = vmatmul.mubr.msk.f32.gmra.mrb[6].mxu1 %vm902_vm3, %v984_v52 }
 0x420   :  { %v2028_v6 = vpop.f32.mrb[0].mxu1 }
 0x421   :  { %v1300_v1 = vadd.f32 %v2028_v6, %v1267_v63  ;;  %v1212_v5 = vpop.f32.mrb[1].mxu1 }
 0x422   :  { %v1299_v4 = vadd.f32 %v1262_v0, %v1212_v5 }
 0x423   :  { %2160 = vtanh.f32 %v1300_v1 }
 0x424   :  { %2162 = vtanh.f32 %v1299_v4  ;;  %v2031_v9 = vpop.f32.mrb[2].mxu1 }
 0x425   :  { %v1302_v11 = vadd.f32 %v2031_v9, %v1277_v3  ;;  %v1222_v2 = vpop.f32.mrb[3].mxu1 }
 0x426   :  { %v1301_v13 = vadd.f32 %v1272_v7, %v1222_v2 }
 0x427   :  { %2164 = vtanh.f32 %v1302_v11 }
 0x428   :  { %2166 = vtanh.f32 %v1301_v13  ;;  %v2034_v50 = vpop.f32.mrb[4].mxu1 }
 0x429   :  { %v1304_v56 = vadd.f32 %v2034_v50, %v1287_v12  ;;  %v1232_v57 = vpop.f32.mrb[5].mxu1 }
 0x42a   :  { %v1303_v51 = vadd.f32 %v1282_v10, %v1232_v57 }
 0x42b   :  { %2168 = vtanh.f32 %v1304_v56 }
 0x42c   :  { %2170 = vtanh.f32 %v1303_v51  ;;  %v2037_v20 = vpop.f32.mrb[6].mxu1 }
 0x42d   :  { %v2161_v8 = vpop.eup %2160  ;;  %v1306_v53 = vadd.f32 %v2037_v20, %v1297_v59  ;;  %v1242_v62 = vpop.f32.mrb[7].mxu1 }
 0x42e   :  { %v2163_v14 = vpop.eup %2162  ;;  %v1305_v15 = vadd.f32 %v1292_v55, %v1242_v62 }
 0x42f   :  { %2172 = vtanh.f32 %v1306_v53  ;;  %v2071_v16 = vpack.c.bf16 %v2161_v8, %v2163_v14 }
 0x430   :  { %2174 = vtanh.f32 %v1305_v15 }
 0x431   :  { %v2165_v17 = vpop.eup %2164  ;;  %2072 = vmatprep.subr.bf16.mxu0 %v2071_v16 }
 0x432   :  { %v2167_v19 = vpop.eup %2166  ;;  %2074 = vmatpush3.bf16.msra.mxu0 %v2071_v16 }
 0x433   :  { %v2075_v21 = vpack.c.bf16 %v2165_v17, %v2167_v19 }
 0x435   :  { %v2169_v22 = vpop.eup %2168  ;;  %2076 = vmatprep.subr.bf16.mxu0 %v2075_v21 }
 0x436   :  { %v2171_v23 = vpop.eup %2170  ;;  %2078 = vmatpush3.bf16.msra.mxu0 %v2075_v21 }
 0x437   :  { %v2079_v24 = vpack.c.bf16 %v2169_v22, %v2171_v23 }
 0x439   :  { %v2173_v25 = vpop.eup %2172  ;;  %2080 = vmatprep.subr.bf16.mxu0 %v2079_v24 }
 0x43a   :  { %v2175_v26 = vpop.eup %2174  ;;  %2082 = vmatpush3.bf16.msra.mxu0 %v2079_v24 }
 0x43b   :  { %v2083_v27 = vpack.c.bf16 %v2173_v25, %v2175_v26 }
 0x43d   :  { %2084 = vmatprep.subr.bf16.mxu0 %v2083_v27 }
 0x43e   :  { %2086 = vmatpush3.bf16.msra.mxu0 %v2083_v27 }
 0x43f   :  { %2087 = vmatprep.subr.bf16.mxu0 %v2245_v31 }
 0x441   :  { %2055 = vmatmul.mubr.msk.f32.vlgmr.msra.gmra.mrb[2].mxu0 %vm1343_vm4, %v1316_v28 }
 0x442   :  { %2057 = vmatprep.mubr.msk.f32.mxu0 %vm1343_vm4, %v1317_v29 }
 0x445   :  { %2058 = vmatmul.mubr.msk.f32.gmra.mrb[4].mxu0 %vm1343_vm4, %v1318_v30 }
 0x446   :  { %2068 = vmatprep.mubr.msk.f32.mxu0 %vm2243_vm2, %v2242_v61 }
 0x514   :  { %v2056_v34 = vpop.f32.mrb[2].mxu0 }
 0x515   :  { %v1428_v35 = vadd.f32 %v2056_v34, %v1331_v32  ;;  %v1422_v36 = vpop.f32.mrb[3].mxu0 }
 0x516   :  { %v1423_v37 = vadd.f32 %v1422_v36, %v1326_v33 }
 0x517   :  { %2176 = vtanh.f32 %v1428_v35 }
 0x518   :  { %2178 = vtanh.f32 %v1423_v37  ;;  %v2059_v39 = vpop.f32.mrb[4].mxu0 }
 0x519   :  { %v1438_v41 = vadd.f32 %v2059_v39, %v1341_v38  ;;  %v1432_v42 = vpop.f32.mrb[5].mxu0 }
 0x51a   :  { %v1433_v43 = vadd.f32 %v1432_v42, %v1336_v40 }
 0x51b   :  { %2180 = vtanh.f32 %v1438_v41 }
 0x51c   :  { %2182 = vtanh.f32 %v1433_v43 }
 0x521   :  { %v2177_v44 = vpop.eup %2176 }
 0x522   :  { %v2179_v61 = vpop.eup %2178 }
 0x523   :  { %v2088_v45 = vpack.c.bf16 %v2177_v44, %v2179_v61 }
 0x525   :  { %v2181_v46 = vpop.eup %2180  ;;  %2089 = vmatpush3.bf16.msra.mxu0 %v2088_v45 }
 0x526   :  { %v2183_v47 = vpop.eup %2182  ;;  %2090 = vmatprep.subr.bf16.mxu0 %v2245_v31 }
 0x527   :  { %v2091_v58 = vpack.c.bf16 %v2181_v46, %v2183_v47 }
 0x529   :  { %2092 = vmatpush3.bf16.msra.mxu0 %v2091_v58 }
 0x52c   :  { %2069 = vmatmul.mubr.msk.f32.vlgmr.msra.gmra.mrb[6].mxu0 %vm1456_vm5, %v1445_v18 }
 0x5ff   :  { %v1526_v52 = vpop.f32.mrb[6].mxu0 }
 0x600   :  { %v1527_v60 = vadd.f32 %v1526_v52, %v1455_v49  ;;  %v2070_v0 = vpop.f32.mrb[7].mxu0 }
 0x602   :  { %1531 = vst.msk [vmem:[#allocation3] sm:$0x1] %vm1530_vm6, %v1527_v60 }
 0x603   :  { %2195 = shalt.err (!%p2192_p5)
}
 0x604   :  { %s2196_s2 = scalar_lea.hbm %s3157_s13, 16 }
 0x605   :  { %p2197_p6 = scmp.ne.s32.totalorder %s3157_s13, %s2196_s2  ;;  %p2200_p7 = scmp.lt.u32.totalorder %s2196_s2, %s3157_s13 }
 0x607   :  { %p2202_p8 = pnand %p2200_p7, %p2197_p6 }
 0x609   :  { %2205 = shalt.err (!%p2202_p8)
}
 0x60a   :  { %1541 = dma.vmem_to_hbm [thread:$0]  %s1539_s4, 16, %s3157_s13, [#allocation4]  }
 0x60b   :  { %2222 = dma.done.wait [#allocation4], 16  }
 0x60c   :  { %2223 = vsyncadd [#allocation4], 4294967280 }
 0x60d   :  { %1545 = vsyncpa [#allocation4], 1 }

</bundles_post_ra>
